<compile_context>
chip_gen: v6e
topology: v6e:2x2x1
jax: 0.10.0
libtpu: 0.0.40
codegen_flags: <defaults>
</compile_context>

<pallas_src>
import functools

import jax
import jax.numpy as jnp
from jax.experimental import pallas as pl
from jax.experimental.pallas import tpu as pltpu

LANE = 128


def _round_up(x, m):
    return (x + m - 1) // m * m


def _tile_caps():
    """MXU-width aware tile caps: 256-wide N/K tiles only on v6e / v7x."""
    try:
        kind = jax.devices()[0].device_kind.lower()
    except Exception:
        kind = ""
    if ("v6" in kind) or ("v7" in kind):
        return 512, 256, 256
    return 512, 128, 128


TM_MAX, TN_MAX, TK_MAX = _tile_caps()


# ----------------------------------------------------------------------------
# Pallas kernels
# ----------------------------------------------------------------------------
def _mm_kernel(a_ref, b_ref, scale_ref, shift_ref, *rest, relu_in, relu_out, has_res):
    """acc = A@B (bf16 x bf16 -> f32); epilogue: *scale + shift (+res) (+relu)."""
    if has_res:
        res_ref, o_ref, acc_ref = rest
    else:
        o_ref, acc_ref = rest

    k = pl.program_id(2)

    @pl.when(k == 0)
    def _():
        acc_ref[...] = jnp.zeros_like(acc_ref)

    a = a_ref[...]
    if relu_in:
        a = jnp.maximum(a, jnp.array(0, a.dtype))
    acc_ref[...] += jnp.dot(a, b_ref[...], preferred_element_type=jnp.float32)

    @pl.when(k == pl.num_programs(2) - 1)
    def _():
        y = acc_ref[...] * scale_ref[...] + shift_ref[...]
        if has_res:
            y = y + res_ref[...].astype(jnp.float32)
        if relu_out:
            y = jnp.maximum(y, 0.0)
        o_ref[...] = y.astype(o_ref.dtype)


def matmul_affine(a, b_p, scale_p, shift_p, *, relu_in=False, relu_out=False,
                  residual=None, out_dtype=jnp.bfloat16):
    """out = epilogue(A @ B).  A: (M, Kp) bf16, B: (Kp, Np) bf16 pre-padded,
    scale/shift: (1, Np) f32, residual (optional): (M, Np) bf16."""
    M, Kp = a.shape
    Kp2, Np = b_p.shape
    assert Kp == Kp2, (Kp, Kp2)
    assert Kp % LANE == 0 and Np % LANE == 0

    tm = min(TM_MAX, _round_up(M, 8))
    tn = TN_MAX if Np % TN_MAX == 0 else 128
    tk = TK_MAX if Kp % TK_MAX == 0 else 128
    grid = (pl.cdiv(M, tm), Np // tn, Kp // tk)

    in_specs = [
        pl.BlockSpec((tm, tk), lambda i, j, k: (i, k)),
        pl.BlockSpec((tk, tn), lambda i, j, k: (k, j)),
        pl.BlockSpec((1, tn), lambda i, j, k: (0, j)),
        pl.BlockSpec((1, tn), lambda i, j, k: (0, j)),
    ]
    inputs = [a, b_p, scale_p, shift_p]
    has_res = residual is not None
    if has_res:
        assert residual.shape == (M, Np), (residual.shape, (M, Np))
        in_specs.append(pl.BlockSpec((tm, tn), lambda i, j, k: (i, j)))
        inputs.append(residual)

    return pl.pallas_call(
        functools.partial(_mm_kernel, relu_in=relu_in, relu_out=relu_out,
                          has_res=has_res),
        out_shape=jax.ShapeDtypeStruct((M, Np), out_dtype),
        grid_spec=pltpu.PrefetchScalarGridSpec(
            num_scalar_prefetch=0,
            grid=grid,
            in_specs=in_specs,
            out_specs=pl.BlockSpec((tm, tn), lambda i, j, k: (i, j)),
            scratch_shapes=[pltpu.VMEM((tm, tn), jnp.float32)],
        ),
        compiler_params=pltpu.CompilerParams(
            dimension_semantics=("parallel", "parallel", "arbitrary")),
    )(*inputs)


def _max9_kernel(x_ref, o_ref):
    o_ref[...] = jnp.max(x_ref[...], axis=0)


# ----------------------------------------------------------------------------
# Layer helpers (JAX glue around the Pallas compute)
# ----------------------------------------------------------------------------
def _im2col(x, kh, kw, stride, pad, k_pad_to):
    """Gather conv patches; K (= kh*kw*C) is padded with zero columns to k_pad_to."""
    N, H, W, C = x.shape
    xp = jnp.pad(x, ((0, 0), (pad, pad), (pad, pad), (0, 0)))
    Ho = (H + 2 * pad - kh) // stride + 1
    Wo = (W + 2 * pad - kw) // stride + 1
    cols = []
    for di in range(kh):
        for dj in range(kw):
            cols.append(
                xp[:, di:di + stride * (Ho - 1) + 1:stride,
                      dj:dj + stride * (Wo - 1) + 1:stride, :])
    K = kh * kw * C
    if k_pad_to > K:
        cols.append(jnp.zeros((N, Ho, Wo, k_pad_to - K), x.dtype))
    patches = jnp.concatenate(cols, axis=-1).reshape(N * Ho * Wo, k_pad_to)
    return patches, Ho, Wo


def conv2d(x, cp, stride, pad, *, relu_in=False, relu_out=False, residual=None):
    """Returns the raw 2-D (M, Np) matmul result plus (Ho, Wo)."""
    N, H, W, C = x.shape
    kh, kw = cp["kh"], cp["kw"]
    Kp = cp["w"].shape[0]
    if kh == 1 and kw == 1:
        if stride != 1:
            x = x[:, ::stride, ::stride, :]
            H, W = x.shape[1], x.shape[2]
        a = x.reshape(N * H * W, C)
        if Kp > C:
            a = jnp.pad(a, ((0, 0), (0, Kp - C)))
        Ho, Wo = H, W
    else:
        a, Ho, Wo = _im2col(x, kh, kw, stride, pad, Kp)
    out = matmul_affine(a, cp["w"], cp["scale"], cp["shift"],
                        relu_in=relu_in, relu_out=relu_out, residual=residual)
    return out, Ho, Wo


def conv_nhwc(x, cp, stride, pad, **kw):
    out, Ho, Wo = conv2d(x, cp, stride, pad, **kw)
    return out[:, :cp["cout"]].reshape(x.shape[0], Ho, Wo, cp["cout"])


def convtranspose2x2(x, tp, *, relu_in=False):
    """ConvTranspose2d(k=2, s=2, bias=False); optional fused pre-ReLU (BN folded)."""
    N, H, W, C = x.shape
    Kp = tp["w"].shape[0]
    a = x.reshape(N * H * W, C)
    if Kp > C:
        a = jnp.pad(a, ((0, 0), (0, Kp - C)))
    out = matmul_affine(a, tp["w"], tp["scale"], tp["shift"], relu_in=relu_in)
    cout = tp["cout"]
    out = out[:, :4 * cout]
    out = out.reshape(N, H, W, 2, 2, cout)
    out = out.transpose(0, 1, 3, 2, 4, 5).reshape(N, 2 * H, 2 * W, cout)
    return out


def maxpool3x3s2(x):
    """3x3 stride-2 max pool (pad 1) as a tiled, lane-dense Pallas reduction."""
    N, H, W, C = x.shape
    xp = jnp.pad(x, ((0, 0), (1, 1), (1, 1), (0, 0)), constant_values=-jnp.inf)
    Ho = (H + 2 - 3) // 2 + 1
    Wo = (W + 2 - 3) // 2 + 1
    slices = []
    for di in range(3):
        for dj in range(3):
            slices.append(
                xp[:, di:di + 2 * (Ho - 1) + 1:2, dj:dj + 2 * (Wo - 1) + 1:2, :])
    stack = jnp.stack(slices, axis=0).reshape(9, N * Ho * Wo * C)
    L = N * Ho * Wo * C
    Lp = _round_up(L, LANE)
    if Lp != L:
        stack = jnp.pad(stack, ((0, 0), (0, Lp - L)), constant_values=-jnp.inf)
    R = Lp // LANE
    stack = stack.reshape(9, R, LANE)
    tme = min(1024, _round_up(R, 8))
    out = pl.pallas_call(
        _max9_kernel,
        out_shape=jax.ShapeDtypeStruct((R, LANE), x.dtype),
        grid_spec=pltpu.PrefetchScalarGridSpec(
            num_scalar_prefetch=0,
            grid=(pl.cdiv(R, tme),),
            in_specs=[pl.BlockSpec((9, tme, LANE), lambda i: (0, i, 0))],
            out_specs=pl.BlockSpec((tme, LANE), lambda i: (i, 0)),
        ),
        compiler_params=pltpu.CompilerParams(dimension_semantics=("parallel",)),
    )(stack)
    return out.reshape(Lp)[:L].reshape(N, Ho, Wo, C)


def basic_block(x, bp, stride):
    N, H, W, C = x.shape
    y = conv_nhwc(x, bp["conv1"], stride, 1, relu_out=True)
    if "ds" in bp:
        idn2d, _, _ = conv2d(x, bp["ds"], stride, 0)          # (M, Np), BN fused
    else:
        Np = bp["conv2"]["w"].shape[1]
        idn2d = x.reshape(N * H * W, C)
        if Np > C:
            idn2d = jnp.pad(idn2d, ((0, 0), (0, Np - C)))
    # conv2 + bn2 + residual add + ReLU, all fused in one kernel epilogue
    return conv_nhwc(y, bp["conv2"], 1, 1, relu_out=True, residual=idn2d)


# ----------------------------------------------------------------------------
# Parameters (deterministic synthetic init — same logical shapes as torch)
# ----------------------------------------------------------------------------
def _conv_w2d(key, kh, kw, cin, cout, scale=0.05):
    w = jax.random.normal(key, (kh, kw, cin, cout), jnp.float32) * scale
    return w.reshape(kh * kw * cin, cout)          # rows ordered (di, dj, cin)


def _bn_affine(key, c, eps=1e-5):
    k1, k2, k3, k4 = jax.random.split(key, 4)
    gamma = 1.0 + 0.1 * jax.random.normal(k1, (c,), jnp.float32)
    beta = 0.1 * jax.random.normal(k2, (c,), jnp.float32)
    mean = 0.1 * jax.random.normal(k3, (c,), jnp.float32)
    var = 1.0 + 0.1 * jnp.abs(jax.random.normal(k4, (c,), jnp.float32))
    s = gamma * jax.lax.rsqrt(var + eps)
    t = beta - mean * s
    return s, t


def _pack(w2d, scale, shift, kh, kw, cout):
    """Pad weight to (Kp, Np) multiples of 128, cast to bf16; pad scale/shift."""
    K, Nn = w2d.shape
    Kp, Np = _round_up(K, LANE), _round_up(Nn, LANE)
    return dict(
        w=jnp.zeros((Kp, Np), jnp.float32).at[:K, :Nn].set(w2d).astype(jnp.bfloat16),
        scale=jnp.zeros((1, Np), jnp.float32).at[0, :Nn].set(scale),
        shift=jnp.zeros((1, Np), jnp.float32).at[0, :Nn].set(shift),
        kh=kh, kw=kw, cout=cout)


def _pack_plain(w2d, kh, kw, cout):
    n = w2d.shape[1]
    return _pack(w2d, jnp.ones((n,), jnp.float32), jnp.zeros((n,), jnp.float32),
                 kh, kw, cout)


def init_params(key, h4, w4):
    keys = iter(jax.random.split(key, 256))
    p = {}

    # stem: 7x7/2 conv + BN + ReLU
    w = _conv_w2d(next(keys), 7, 7, 3, 64)
    s, t = _bn_affine(next(keys), 64)
    p["conv1"] = _pack(w, s, t, 7, 7, 64)

    def block_params(cin, cout, downsample):
        bp = {}
        w1 = _conv_w2d(next(keys), 3, 3, cin, cout)
        s1, t1 = _bn_affine(next(keys), cout)
        bp["conv1"] = _pack(w1, s1, t1, 3, 3, cout)
        w2 = _conv_w2d(next(keys), 3, 3, cout, cout)
        s2, t2 = _bn_affine(next(keys), cout)
        bp["conv2"] = _pack(w2, s2, t2, 3, 3, cout)
        if downsample:
            wd = _conv_w2d(next(keys), 1, 1, cin, cout)
            sd, td = _bn_affine(next(keys), cout)
            bp["ds"] = _pack(wd, sd, td, 1, 1, cout)
        return bp

    p["layer1"] = [block_params(64, 64, False), block_params(64, 64, False)]
    p["layer2"] = [block_params(64, 128, True), block_params(128, 128, False)]
    p["layer3"] = [block_params(128, 256, True), block_params(256, 256, False)]
    p["layer4"] = [block_params(256, 512, True), block_params(512, 512, False)]

    p["singleconv1"] = _pack_plain(_conv_w2d(next(keys), 1, 1, 64, 128), 1, 1, 128)
    p["singleconv2"] = _pack_plain(_conv_w2d(next(keys), 1, 1, 128, 256), 1, 1, 256)
    p["singleconv3"] = _pack_plain(_conv_w2d(next(keys), 1, 1, 256, 256), 1, 1, 256)

    def trans_w(k, cin, cout):
        w = jax.random.normal(k, (cin, 2, 2, cout), jnp.float32) * 0.05
        return w.reshape(cin, 4 * cout)            # cols ordered (di, dj, cout)

    # convtrans1: plain transposed conv
    p["convtrans1"] = _pack_plain(trans_w(next(keys), 512, 256), 1, 1, 256)
    # convtrans2/3: preceding ReLU+BN folded into the weights (ReLU stays in-kernel)
    s2, t2 = _bn_affine(next(keys), 512)
    w2 = trans_w(next(keys), 512, 256)
    p["convtrans2"] = _pack(s2[:, None] * w2, jnp.ones((4 * 256,), jnp.float32),
                            t2 @ w2, 1, 1, 256)
    s3, t3 = _bn_affine(next(keys), 512)
    w3 = trans_w(next(keys), 512, 128)
    p["convtrans3"] = _pack(s3[:, None] * w3, jnp.ones((4 * 128,), jnp.float32),
                            t3 @ w3, 1, 1, 128)

    # relubn + both 1x1 heads fused into one 256->6 matmul (cols 0:3 seg, 3:6 det)
    sr, tr = _bn_affine(next(keys), 256)
    w_seg = _conv_w2d(next(keys), 1, 1, 256, 3)
    w_det = _conv_w2d(next(keys), 1, 1, 256, 3)
    w_heads = jnp.concatenate([w_seg, w_det], axis=1)
    p["heads"] = _pack(sr[:, None] * w_heads, jnp.ones((6,), jnp.float32),
                       tr @ w_heads, 1, 1, 6)

    p["loc_bias"] = jax.random.normal(next(keys), (1, 3, h4, w4), jnp.float32)  # NCHW
    return p


# ----------------------------------------------------------------------------
# Forward pass (mirrors nimbrRoNet2.forward)
# ----------------------------------------------------------------------------
def forward(params, x_nchw):
    x = jnp.transpose(x_nchw, (0, 2, 3, 1)).astype(jnp.bfloat16)   # NHWC bf16

    # resnet_layer1 = conv1 + bn1 + relu + maxpool + layer1
    x = conv_nhwc(x, params["conv1"], 2, 3, relu_out=True)
    x = maxpool3x3s2(x)
    for bp in params["layer1"]:
        x = basic_block(x, bp, 1)
    x1 = x
    for i, bp in enumerate(params["layer2"]):
        x = basic_block(x, bp, 2 if i == 0 else 1)
    x2 = x
    for i, bp in enumerate(params["layer3"]):
        x = basic_block(x, bp, 2 if i == 0 else 1)
    x3 = x
    for i, bp in enumerate(params["layer4"]):
        x = basic_block(x, bp, 2 if i == 0 else 1)
    rnet_output = x

    i1 = conv_nhwc(x1, params["singleconv1"], 1, 0)
    i2 = conv_nhwc(x2, params["singleconv2"], 1, 0)
    i3 = conv_nhwc(x3, params["singleconv3"], 1, 0)

    o1 = convtranspose2x2(rnet_output, params["convtrans1"])
    o1 = jnp.concatenate([o1, i3], axis=-1)                  # torch cat dim=1
    o2 = convtranspose2x2(o1, params["convtrans2"], relu_in=True)   # ReLU+BN fused
    o2 = jnp.concatenate([o2, i2], axis=-1)
    o3 = convtranspose2x2(o2, params["convtrans3"], relu_in=True)   # ReLU+BN fused
    o3 = jnp.concatenate([o3, i1], axis=-1)

    # relubn + segment_head + detection_head fused into one matmul
    N, H4, W4, _ = o3.shape
    heads2d, _, _ = conv2d(o3, params["heads"], 1, 0, relu_in=True)
    heads = heads2d[:, :6].astype(jnp.float32).reshape(N, H4, W4, 6)
    loc = jnp.transpose(params["loc_bias"], (0, 2, 3, 1))            # (1,H4,W4,3)
    seg = heads[..., 0:3] + loc
    det = heads[..., 3:6] + loc
    return jnp.transpose(seg, (0, 3, 1, 2)), jnp.transpose(det, (0, 3, 1, 2))


# ----------------------------------------------------------------------------
if __name__ == "__main__":
    key = jax.random.PRNGKey(0)
    kx, kp, kchk = jax.random.split(key, 3)

    # sanity check: fused matmul kernel (bf16 MXU, f32 acc, residual + relu epilogue)
    ka, kb, kr = jax.random.split(kchk, 3)
    A = jax.random.normal(ka, (600, 256), jnp.float32).astype(jnp.bfloat16)
    B = jax.random.normal(kb, (256, 128), jnp.float32).astype(jnp.bfloat16)
    R = jax.random.normal(kr, (600, 128), jnp.float32).astype(jnp.bfloat16)
    sc = jnp.full((1, 128), 1.5, jnp.float32)
    sh = jnp.full((1, 128), 0.25, jnp.float32)
    got = matmul_affine(A, B, sc, sh, residual=R, relu_out=True,
                        out_dtype=jnp.float32)
    ref = jnp.maximum(
        jnp.dot(A, B, preferred_element_type=jnp.float32) * 1.5 + 0.25
        + R.astype(jnp.float32), 0.0)
    assert jnp.allclose(got, ref, atol=2e-2, rtol=2e-2), "matmul kernel mismatch"

    N, C, H, W = 2, 3, 64, 64            # small, /32-divisible spatial size
    x = jax.random.normal(kx, (N, C, H, W), jnp.float32)
    params = init_params(kp, H // 4, W // 4)

    seg_out, det_out = forward(params, x)
    seg_out = jax.block_until_ready(seg_out)
    det_out = jax.block_until_ready(det_out)

    assert seg_out.shape == (N, 3, H // 4, W // 4)
    assert det_out.shape == (N, 3, H // 4, W // 4)
    assert bool(jnp.isfinite(seg_out).all()) and bool(jnp.isfinite(det_out).all())
    print("KERNEL_OK")
</pallas_src>

<mosaic_0001>
module attributes {stable_mosaic.version = 11 : i64} {
  func.func @_mm_kernel(%arg0: i32, %arg1: i32, %arg2: i32, %arg3: memref<512x128xbf16, #tpu.memory_space<vmem>>, %arg4: memref<128x128xbf16, #tpu.memory_space<vmem>>, %arg5: memref<1x128xf32, #tpu.memory_space<vmem>>, %arg6: memref<1x128xf32, #tpu.memory_space<vmem>>, %arg7: memref<512x128xbf16, #tpu.memory_space<vmem>>, %arg8: memref<512x128xf32, #tpu.memory_space<vmem>>, %arg9: memref<512x128xf32, #tpu.memory_space<vmem>>) attributes {dimension_semantics = [#tpu.dimension_semantics<parallel>, #tpu.dimension_semantics<parallel>, #tpu.dimension_semantics<arbitrary>], iteration_bounds = array<i64: 2, 1, 2>, scalar_prefetch = 0 : i64, scratch_operands = 1 : i64, tpu.core_type = #tpu.core_type<tc>, window_params = [{transform_indices = @transform_0, window_bounds = array<i64: 512, 128>}, {transform_indices = @transform_1, window_bounds = array<i64: 128, 128>}, {transform_indices = @transform_2, window_bounds = array<i64: 1, 128>}, {transform_indices = @transform_3, window_bounds = array<i64: 1, 128>}, {transform_indices = @transform_4, window_bounds = array<i64: 512, 128>}, {transform_indices = @transform_5, window_bounds = array<i64: 512, 128>}]} {
    %c0_i32 = arith.constant 0 : i32
    %0 = arith.cmpi eq, %arg2, %c0_i32 : i32
    %1 = arith.extui %0 : i1 to i32
    %c0_i32_0 = arith.constant 0 : i32
    %2 = arith.cmpi ne, %1, %c0_i32_0 : i32
    scf.if %2 {
      %cst_9 = arith.constant 0.000000e+00 : f32
      %12 = vector.broadcast %cst_9 : f32 to vector<512x128xf32>
      %c0_10 = arith.constant 0 : index
      %c0_11 = arith.constant 0 : index
      %13 = vector.load %arg9[%c0_10, %c0_11] : memref<512x128xf32, #tpu.memory_space<vmem>>, vector<512x128xf32>
      tpu.vector_store %arg9[%c0_10, %c0_11], %12 {strides = array<i32>} : memref<512x128xf32, #tpu.memory_space<vmem>>, vector<512x128xf32>,
    } else {
    }
    %c0 = arith.constant 0 : index
    %c0_1 = arith.constant 0 : index
    %3 = vector.load %arg3[%c0, %c0_1] : memref<512x128xbf16, #tpu.memory_space<vmem>>, vector<512x128xbf16>
    %c0_2 = arith.constant 0 : index
    %c0_3 = arith.constant 0 : index
    %4 = vector.load %arg9[%c0_2, %c0_3] : memref<512x128xf32, #tpu.memory_space<vmem>>, vector<512x128xf32>
    %c0_4 = arith.constant 0 : index
    %c0_5 = arith.constant 0 : index
    %5 = vector.load %arg4[%c0_4, %c0_5] : memref<128x128xbf16, #tpu.memory_space<vmem>>, vector<128x128xbf16>
    %cst = arith.constant dense<0.000000e+00> : vector<512x128xf32>
    %6 = tpu.matmul %3, %5, %cst {dimension_numbers = #tpu.dot_dimension_numbers<[1], [0], [0], [1], [0, 0, 1, 1], [], []>} : vector<512x128xbf16>, vector<128x128xbf16>, vector<512x128xf32> -> vector<512x128xf32>
    %7 = arith.addf %4, %6 : vector<512x128xf32>
    %c0_6 = arith.constant 0 : index
    %c0_7 = arith.constant 0 : index
    %8 = vector.load %arg9[%c0_6, %c0_7] : memref<512x128xf32, #tpu.memory_space<vmem>>, vector<512x128xf32>
    tpu.vector_store %arg9[%c0_6, %c0_7], %7 {strides = array<i32>} : memref<512x128xf32, #tpu.memory_space<vmem>>, vector<512x128xf32>,
    %c1_i32 = arith.constant 1 : i32
    %9 = arith.cmpi eq, %arg2, %c1_i32 : i32
    %10 = arith.extui %9 : i1 to i32
    %c0_i32_8 = arith.constant 0 : i32
    %11 = arith.cmpi ne, %10, %c0_i32_8 : i32
    scf.if %11 {
      %c0_9 = arith.constant 0 : index
      %c0_10 = arith.constant 0 : index
      %12 = vector.load %arg9[%c0_9, %c0_10] : memref<512x128xf32, #tpu.memory_space<vmem>>, vector<512x128xf32>
      %c0_11 = arith.constant 0 : index
      %c0_12 = arith.constant 0 : index
      %13 = vector.load %arg5[%c0_11, %c0_12] : memref<1x128xf32, #tpu.memory_space<vmem>>, vector<1x128xf32>
      %14 = vector.broadcast %13 : vector<1x128xf32> to vector<512x128xf32>
      %15 = arith.mulf %12, %14 : vector<512x128xf32>
      %c0_13 = arith.constant 0 : index
      %c0_14 = arith.constant 0 : index
      %16 = vector.load %arg6[%c0_13, %c0_14] : memref<1x128xf32, #tpu.memory_space<vmem>>, vector<1x128xf32>
      %17 = vector.broadcast %16 : vector<1x128xf32> to vector<512x128xf32>
      %18 = arith.addf %15, %17 : vector<512x128xf32>
      %c0_15 = arith.constant 0 : index
      %c0_16 = arith.constant 0 : index
      %19 = vector.load %arg7[%c0_15, %c0_16] : memref<512x128xbf16, #tpu.memory_space<vmem>>, vector<512x128xbf16>
      %20 = arith.extf %19 : vector<512x128xbf16> to vector<512x128xf32>
      %21 = arith.addf %18, %20 : vector<512x128xf32>
      %cst_17 = arith.constant 0.000000e+00 : f32
      %22 = vector.broadcast %cst_17 : f32 to vector<512x128xf32>
      %23 = arith.maximumf %21, %22 : vector<512x128xf32>
      %c0_18 = arith.constant 0 : index
      %c0_19 = arith.constant 0 : index
      %24 = vector.load %arg8[%c0_18, %c0_19] : memref<512x128xf32, #tpu.memory_space<vmem>>, vector<512x128xf32>
      tpu.vector_store %arg8[%c0_18, %c0_19], %23 {strides = array<i32>} : memref<512x128xf32, #tpu.memory_space<vmem>>, vector<512x128xf32>,
    } else {
    }
    return
  }
  func.func @transform_0(%arg0: i32, %arg1: i32, %arg2: i32) -> (i32, i32) {
    %c0_i32 = arith.constant 0 : i32
    return %arg0, %arg2 : i32, i32
  }
  func.func @transform_1(%arg0: i32, %arg1: i32, %arg2: i32) -> (i32, i32) {
    %c0_i32 = arith.constant 0 : i32
    return %arg2, %arg1 : i32, i32
  }
  func.func @transform_2(%arg0: i32, %arg1: i32, %arg2: i32) -> (i32, i32) {
    %c0_i32 = arith.constant 0 : i32
    %c0_i32_0 = arith.constant 0 : i32
    return %c0_i32, %arg1 : i32, i32
  }
  func.func @transform_3(%arg0: i32, %arg1: i32, %arg2: i32) -> (i32, i32) {
    %c0_i32 = arith.constant 0 : i32
    %c0_i32_0 = arith.constant 0 : i32
    return %c0_i32, %arg1 : i32, i32
  }
  func.func @transform_4(%arg0: i32, %arg1: i32, %arg2: i32) -> (i32, i32) {
    %c0_i32 = arith.constant 0 : i32
    return %arg0, %arg1 : i32, i32
  }
  func.func @transform_5(%arg0: i32, %arg1: i32, %arg2: i32) -> (i32, i32) {
    %c0_i32 = arith.constant 0 : i32
    return %arg0, %arg1 : i32, i32
  }
}

</mosaic_0001>

<bundles_post_ra>
// kernel: tpu_custom_call.1
= control target key start
LH: loop header
LB: loop body
LE: loop exit
PB: predicated region body
PF: predicated region fallthrough
CT: control target
= control target key end

     0   :  { %s3531_s0 = inlined_call_operand.hbm [shape: bf16[600,256], index: 0, kind: input, shape index: {}]   ;;  %s3532_s1 = inlined_call_operand.hbm [shape: bf16[256,128], index: 1, kind: input, shape index: {}]   ;;  %s3533_s2 = inlined_call_operand.vmem [shape: f32[1,128], index: 2, kind: input, shape index: {}]   ;;  %s3534_s3 = inlined_call_operand.vmem [shape: f32[1,128], index: 3, kind: input, shape index: {}]   ;;  %s3535_s4 = inlined_call_operand.hbm [shape: bf16[600,128], index: 4, kind: input, shape index: {}]   ;;  %s3536_s5 = inlined_call_operand.hbm [shape: f32[600,128], index: 5, kind: output, shape index: {}]  }
   0x1   :  { %3552 = sst [smem:[#allocation28_spill]] %s3531_s0 }
   0x2   :  { %3553 = sst [smem:[#allocation29_spill]] %s3533_s2 }
   0x3   :  { %3554 = sst [smem:[#allocation30_spill]] %s3534_s3 }
   0x4   :  { %3555 = sst [smem:[#allocation31_spill]] %s3536_s5 }
   0x5   :  { %10 = vsyncpa [#allocation4], 0 }
   0x6   :  { %12 = vsyncpa [#allocation4 + $0x1], 0 }
   0x7   :  { %13 = vsyncpa [#allocation7], 0 }
   0x8   :  { %15 = vsyncpa [#allocation7 + $0x1], 0 }
   0x9   :  { %16 = vsyncpa [#allocation5], 0 }
   0xa   :  { %18 = vsyncpa [#allocation5 + $0x1], 0  ;;  %s2819_s18 = smov 0   ;;  %s2821_s19 = smov 0  }
   0xb   :  { %s2823_s20 = smov 0   ;;  %s2825_s21 = smov 0  }
   0xc   :  { %s2827_s22 = smov 0   ;;  %s2829_s23 = smov 0  }
   0xd   :  { %s2831_s24 = smov 0   ;;  %s2833_s25 = smov 0  }
   0xe   :  { %s2835_s26 = smov 0   ;;  %s2837_s27 = smov 0  }
   0xf   :  { %s2839_s28 = smov 0   ;;  %s2841_s29 = smov 0  }
  0x10   :  { %s2843_s30 = smov 0   ;;  %s2845_s6 = smov 0  }
  0x11 LB: > { %3556 = sst [smem:[#allocation14_spill]] %s2721_s18  ;;  %s2888_s7 = sadd.s32 4294967295, %s2773_s6   ;;  %s2773_s6 = sphi %s2845_s6, %s24_s6   ;;  %s2769_s30 = sphi %s2843_s30, %s3615_s30   ;;  %s2765_s29 = sphi %s2841_s29, %s3614_s29   ;;  %s2761_s28 = sphi %s2839_s28, %s3613_s28   ;;  %s2757_s27 = sphi %s2837_s27, %s3612_s27   ;;  %s2753_s26 = sphi %s2835_s26, %s3601_s26   ;;  %s2749_s25 = sphi %s2833_s25, %s3611_s25   ;;  %s2745_s24 = sphi %s2831_s24, %s3610_s24   ;;  %s2741_s23 = sphi %s2829_s23, %s3609_s23   ;;  %s2737_s22 = sphi %s2827_s22, %s3608_s22   ;;  %s2733_s21 = sphi %s2825_s21, %s3607_s21   ;;  %s2729_s20 = sphi %s2823_s20, %s3606_s20   ;;  %s2725_s19 = sphi %s2821_s19, %s3605_s19   ;;  %s2721_s18 = sphi %s2819_s18, %s3597_s18  }
  0x12   : > { %3557 = sst [smem:[#allocation15_spill]] %s2725_s19  ;;  %s36_s9 = sadd.s32 1, %s2765_s29 }
  0x13   : > { %3558 = sst [smem:[#allocation16_spill]] %s2753_s26  ;;  %s43_s10 = sadd.s32 1, %s2769_s30 }
  0x14   : > { %3559 = sst [smem:[#allocation17_spill]] %s2757_s27  ;;  %p37_p0 = scmp.ge.s32.totalorder %s36_s9, 2 }
  0x15   : > { %3560 = sst [smem:[#allocation18_spill]] %s2761_s28  ;;  %s52_s11 = sadd.s32 1, %s2753_s26 }
  0x16   : > { %p59_p1 = scmp.ne.s32.totalorder %s2753_s26, %s2749_s25  ;;  %p60_p2 = scmp.eq.s32.totalorder %s2773_s6, 0 }
  0x17   : > { %s3617_s9 = smov (%p37_p0, %s36_s9), 0  ;;  %s3619_s10 = smov (!%p37_p0, %s43_s10), %s2769_s30 }
  0x18   : > { %3561 = sst [smem:[#allocation19_spill]] %s3617_s9  ;;  %s48_s12 = ssub.s32 %s2765_s29, %s3617_s9 }
  0x19   : > { %p2904_p3 = por %p60_p2, %p59_p1  ;;  %p45_p4 = scmp.ge.s32.totalorder %s3619_s10, 2 }
  0x1a   : > { %p65_p5 = scmp.ne.s32.totalorder %s2749_s25, %s2745_s24  ;;  %p66_p6 = scmp.eq.s32.totalorder %s2888_s7, 0 }
  0x1b   : > { %p78_p7 = scmp.eq.s32.totalorder %s48_s12, 0  ;;  %s3621_s10 = smov (%p45_p4, %s3619_s10), 0 }
  0x1c   : > { %3563 = sst [smem:[#allocation20_spill]] %s3621_s10  ;;  %p2914_p8 = por %p66_p6, %p65_p5 }
  0x1d   : > { %s80_s15 = sadd.s32 1, %s2741_s23  ;;  %s47_s16 = ssub.s32 %s2769_s30, %s3621_s10 }
  0x1e   : > { %p87_p9 = scmp.ne.s32.totalorder %s2741_s23, %s2737_s22  ;;  %s49_s17 = sor.u32 %s48_s12, %s47_s16 }
  0x1f   : > { %p93_p10 = scmp.ne.s32.totalorder %s2737_s22, %s2733_s21  ;;  %p50_p11 = scmp.eq.s32.totalorder %s49_s17, 0 }
  0x20   : > { %p2927_p12 = por %p87_p9, %p60_p2  ;;  %p158_p0 = scmp.eq.s32.totalorder %s47_s16, 0 }
  0x21   : > { %s2932_s8 = scalar_select %p78_p7, %s2741_s23, %s80_s15  }
  0x22   : > { %s2935_s9 = scalar_select %p50_p11, %s2753_s26, %s52_s11  }
  0x23   : > { %3566 = sst [smem:[#allocation21_spill]] %s2932_s8  ;;  %p2939_p13 = por %p93_p10, %p66_p6 }
  0x24   : > { %3567 = sst [smem:[#allocation22_spill]] %s2935_s9  ;;  %s160_s10 = sadd.s32 1, %s2729_s20 }
  0x25   : > { %s3568_s5 = scalar_select %p2939_p13, 1, 0 }
  0x26   : > { %p167_p1 = scmp.ne.s32.totalorder %s2729_s20, %s2725_s19  ;;  %p173_p5 = scmp.ne.s32.totalorder %s2725_s19, %s2721_s18 }
  0x27   : > { %3569 = sst [smem:[#allocation23_spill]] %s3568_s5  ;;  %p199_p7 = scmp.eq.s32.totalorder %s2888_s7, 3 }
  0x28   : > { %s2947_s12 = scalar_select %p158_p0, %s2729_s20, %s160_s10  }
  0x29   : > { %p2951_p4 = por %p167_p1, %p60_p2  ;;  %s3572_s15 = sadd.s32 4294967294, %s2773_s6  }
  0x2a   : > { %3570 = sst [smem:[#allocation24_spill]] %s2947_s12  ;;  %p205_p9 = scmp.eq.s32.totalorder %s3572_s15, 3 }
  0x2b   : > { %p2962_p11 = por %p173_p5, %p66_p6  ;;  %p2966_p10 = por %p199_p7, %p167_p1 }
  0x2c   : > { %p2970_p0 = por %p205_p9, %p173_p5  ;;  %p1995_p2 = scmp.ge.s32.totalorder %s2773_s6, 4 }
  0x2d   : > { %s3573_s11 = scalar_select %p2962_p11, 1, 0 }
  0x2e   : > { %s3575_s16 = scalar_select %p2966_p10, 1, 0 }
  0x2f   : > { %3574 = sst [smem:[#allocation25_spill]] %s3573_s11  ;;  %233 = sbr.rel (%p1995_p2) target bundleno = 140 (0x8c), region = 24 }
  0x30   : > { %3576 = sst [smem:[#allocation26_spill]] %s3575_s16 }
  0x31   : > { %s3577_s10 = scalar_select %p2970_p0, 1, 0 }
  0x33   : > { %3578 = sst [smem:[#allocation27_spill]] %s3577_s10 }
  0x34   : > { %236 = sbr.rel (!%p2904_p3) target bundleno = 92 (0x5c), region = 28  ;;  %s237_s17 = sand.u32 (%p2904_p3), 1, %s2753_s26  }
  0x35   : > { %s1997_s15 = sshll.u32 (%p2904_p3), %s2769_s30, 6  ;;  %s1996_s9 = sshll.u32 (%p2904_p3), %s237_s17, 8 }
  0x36   : > { %s243_s8 = ssub.s32 (%p2904_p3), 75, %s1997_s15  ;;  %s2982_s28 = scalar_lea.sflag (%p2904_p3), [#allocation4], %s237_s17 }
  0x37   : > { %p244_p6 = scmp.lt.s32.totalorder (%p2904_p3), %s243_s8, 64  ;;  %s241_s10 = scalar_lea.vmem (%p2904_p3), [#allocation3], %s1996_s9 }
  0x39   : > { %s3623_s8 = smov (!%p244_p6, %s243_s8), 64 }
  0x3a   : > { %s2979_s12 = sshll.u32 %s3623_s8, 6 }
  0x3b   : > { %s248_s18 = ssub.s32 4096, %s2979_s12 }
  0x3c   : > { %249 = vsyncadd %s2982_s28, %s248_s18  ;;  %p1999_p3 = scmp.ne.s32.totalorder %s2979_s12, 0  ;;  %s2072_s13 = sshll.u32 %s2769_s30, 7 }
  0x3d   : > { %s252_s26 = sadd.s32 %s2765_s29, %s2072_s13  ;;  %s256_s15 = sshll.u32 %s241_s10, 4  ;;  %s2988_s15 = int_to_ptr.vmem [resolvable:$true] %s256_s15 }
  0x3e   : > { %s2001_s16 = sshll.u32 %s252_s26, 6  ;;  %s3579_s0 = sld [smem:[#allocation28_spill]] }
  0x44   : > { %s2993_s17 = scalar_lea.hbm %s3579_s0, %s2001_s16  ;;  %s2547_s13 = scalar_lea.hbm %s3579_s0, 9600 }
  0x45   : > { %s2543_s18 = scalar_lea.hbm %s2993_s17, %s2979_s12 }
  0x46   : > { %p2544_p1 = scmp.ne.s32.totalorder %s2993_s17, %s2543_s18  ;;  %p2549_p9 = scmp.lt.s32.totalorder %s2547_s13, %s2543_s18 }
  0x48   : > { %p2545_p5 = pnand %p2544_p1, %p1999_p3 }
  0x4a   : > { %p2546_p7 = pneg %p2545_p5 }
  0x4c   : > { %p2551_p2 = pnand %p2549_p9, %p2546_p7 }
  0x4e   : > { %2554 = shalt.err (!%p2551_p2)
}
  0x4f   : > { %s2555_s3 = scalar_lea.vmem %s2988_s15, %s2979_s12  ;;  %s2775_s26 = smov [#allocation3]  }
  0x50   : > { %p2556_p6 = scmp.ne.s32.totalorder %s2988_s15, %s2555_s3  ;;  %s2559_s16 = sshll.u32 %s2775_s26, 4  ;;  %s2560_s16 = int_to_ptr.vmem [resolvable:$false] %s2559_s16 }
  0x51   : > { %s2561_s10 = scalar_lea.vmem %s2560_s16, 8192  ;;  %p2562_p1 = scmp.lt.s32.totalorder %s2988_s15, %s2560_s16 }
  0x52   : > { %p2557_p0 = pnand %p2556_p6, %p1999_p3  ;;  %p2563_p5 = scmp.lt.s32.totalorder %s2561_s10, %s2555_s3 }
  0x54   : > { %p2558_p10 = pneg %p2557_p0  ;;  %p2564_p11 = por %p2563_p5, %p2562_p1 }
  0x56   : > { %p2565_p13 = pnand %p2564_p11, %p2558_p10 }
  0x58   : > { %2568 = shalt.err (!%p2565_p13)
}
  0x59   : > { %s2776_s2 = smov 128   ;;  %s2777_s8 = smov 64  }
  0x5a   : > { %s2778_s18 = smov 4  }
  0x5b   : > { %262 = dma.hbm_to_vmem [thread:$0]  (%p1999_p3), %s2993_s17, %s2979_s12, %s2988_s15, %s2982_s28, %s2776_s2, %s2777_s8, %s2778_s18  }
  0x5c PF: > { %s266_s9 = sand.u32 1, %s2773_s6   ;;  %s268_s13 = sand.u32 1, %s2741_s23  }
  0x5d   : > { %s2004_s3 = sshll.u32 %s268_s13, 6  ;;  %s2073_s26 = sshll.u32 %s2765_s29, 10 }
  0x5e   : > { %s277_s0 = scalar_lea.hbm %s3532_s1, %s2073_s26  ;;  %s270_s27 = scalar_lea.vmem [#allocation6], %s2004_s3 }
  0x5f   : > { %s278_s11 = sshll.u32 %s270_s27, 4  ;;  %s3021_s19 = scalar_lea.sflag [#allocation7], %s266_s9  ;;  %s279_s11 = int_to_ptr.vmem [resolvable:$true] %s278_s11 }
  0x60   : > { %s2581_s5 = scalar_lea.vmem %s279_s11, 1024  ;;  %s2779_s28 = smov [#allocation6]  }
  0x61   : > { %p2582_p13 = scmp.ne.s32.totalorder %s279_s11, %s2581_s5  ;;  %s2585_s12 = sshll.u32 %s2779_s28, 4  ;;  %s2586_s12 = int_to_ptr.vmem [resolvable:$false] %s2585_s12 }
  0x62   : > { %s2587_s15 = scalar_lea.vmem %s2586_s12, 2048  ;;  %p2588_p0 = scmp.lt.s32.totalorder %s279_s11, %s2586_s12 }
  0x63   : > { %p2583_p11 = pnand %p2582_p13, %p2927_p12  ;;  %p2589_p3 = scmp.lt.s32.totalorder %s2587_s15, %s2581_s5 }
  0x65   : > { %p2584_p10 = pneg %p2583_p11  ;;  %p2590_p7 = por %p2589_p3, %p2588_p0 }
  0x67   : > { %p2591_p9 = pnand %p2590_p7, %p2584_p10 }
  0x69   : > { %2594 = shalt.err (!%p2591_p9)
}
  0x6a   : > { %s2780_s17 = smov 64   ;;  %s2781_s27 = smov 4  }
  0x6b   : > { %2371 = dma.hbm_to_vmem [thread:$0]  (%p2927_p12), %s277_s0, 1024, %s279_s11, %s3021_s19, %s2780_s17, %s2780_s17, %s2781_s27  }
  0x6c   : > { %287 = sbr.rel (!%p2951_p4) target bundleno = 140 (0x8c), region = 36  ;;  %s290_s2 = sand.u32 (%p2951_p4), 1, %s2729_s20  }
  0x6d   : > { %s2008_s8 = sshll.u32 (%p2951_p4), %s2769_s30, 6  ;;  %s2007_s18 = sshll.u32 (%p2951_p4), %s290_s2, 8 }
  0x6e   : > { %s294_s9 = ssub.s32 (%p2951_p4), 75, %s2008_s8  ;;  %s292_s3 = scalar_lea.vmem (%p2951_p4), [#allocation8], %s2007_s18 }
  0x6f   : > { %p295_p2 = scmp.lt.s32.totalorder (%p2951_p4), %s294_s9, 64 }
  0x71   : > { %s3625_s9 = smov (!%p295_p2, %s294_s9), 64 }
  0x72   : > { %s3032_s5 = sshll.u32 %s3625_s9, 6 }
  0x73   : > { %s299_s13 = ssub.s32 4096, %s3032_s5 }
  0x74   : > { %300 = vsyncadd %s3021_s19, %s299_s13  ;;  %p2010_p12 = scmp.ne.s32.totalorder %s3032_s5, 0  ;;  %s2074_s0 = sshll.u32 %s2769_s30, 12 }
  0x75   : > { %s3041_s11 = scalar_lea.hbm %s3535_s4, %s2074_s0  ;;  %s306_s26 = sshll.u32 %s292_s3, 4  ;;  %s3043_s26 = int_to_ptr.vmem [resolvable:$true] %s306_s26 }
  0x76   : > { %s2595_s16 = scalar_lea.hbm %s3041_s11, %s3032_s5  ;;  %s2599_s12 = scalar_lea.hbm %s3535_s4, 4800 }
  0x77   : > { %p2596_p4 = scmp.ne.s32.totalorder %s3041_s11, %s2595_s16  ;;  %p2601_p5 = scmp.lt.s32.totalorder %s2599_s12, %s2595_s16 }
  0x79   : > { %p2597_p6 = pnand %p2596_p4, %p2010_p12 }
  0x7b   : > { %p2598_p1 = pneg %p2597_p6 }
  0x7d   : > { %p2603_p13 = pnand %p2601_p5, %p2598_p1 }
  0x7f   : > { %2606 = shalt.err (!%p2603_p13)
}
  0x80   : > { %s2607_s15 = scalar_lea.vmem %s3043_s26, %s3032_s5  ;;  %s2782_s17 = smov [#allocation8]  }
  0x81   : > { %p2608_p11 = scmp.ne.s32.totalorder %s3043_s26, %s2607_s15  ;;  %s2611_s27 = sshll.u32 %s2782_s17, 4  ;;  %s2612_s27 = int_to_ptr.vmem [resolvable:$false] %s2611_s27 }
  0x82   : > { %s2613_s2 = scalar_lea.vmem %s2612_s27, 8192  ;;  %p2614_p3 = scmp.lt.s32.totalorder %s3043_s26, %s2612_s27 }
  0x83   : > { %p2609_p10 = pnand %p2608_p11, %p2010_p12  ;;  %p2615_p7 = scmp.lt.s32.totalorder %s2613_s2, %s2607_s15 }
  0x85   : > { %p2610_p0 = pneg %p2609_p10  ;;  %p2616_p9 = por %p2615_p7, %p2614_p3 }
  0x87   : > { %p2617_p2 = pnand %p2616_p9, %p2610_p0 }
  0x89   : > { %2620 = shalt.err (!%p2617_p2)
}
  0x8a   : > { %s2783_s8 = smov 64   ;;  %s2784_s18 = smov 4  }
  0x8b   : > { %312 = dma.hbm_to_vmem [thread:$0]  (%p2010_p12), %s3041_s11, %s3032_s5, %s3043_s26, %s3021_s19, %s2783_s8, %s2783_s8, %s2784_s18  }
  0x8c PF: > { %p2014_p4 = scmp.ge.s32.totalorder %s2773_s6, 1  ;;  %p314_p6 = scmp.lt.s32.totalorder %s2773_s6, 5 }
  0x8e   : > { %p315_p1 = pnand %p2014_p4, %p314_p6 }
  0x8f   : > { %s320_s9 = sand.u32 (!%p315_p1), 1, %s2749_s25  }
  0x90   : > { %318 = sbr.rel (%p315_p1) target bundleno = 638 (0x27e), region = 40  ;;  %s2015_s13 = sshll.u32 (!%p315_p1), %s320_s9, 8 }
  0x91   : > { %s321_s3 = scalar_lea.sflag (!%p315_p1), [#allocation4], %s320_s9  ;;  %s3068_s0 = scalar_lea.vmem (!%p315_p1), [#allocation3], %s2015_s13 }
  0x95   : > { %2704 = dma.done.wait (%p2914_p8), %s321_s3, 4096  }
  0x96   : > { %2706 = vsyncadd (%p2914_p8), %s321_s3, 4294963200  ;;  %s3580_s19 = sld [smem:[#allocation23_spill]]  ;;  %s329_s5 = sand.u32 1, %s2888_s7  }
  0x97   : > { %s331_s24 = sand.u32 1, %s2737_s22   ;;  %s330_s11 = scalar_lea.sflag [#allocation7], %s329_s5 }
  0x98   : > { %s2016_s21 = sshll.u32 %s331_s24, 6 }
  0x99   : > { %s3076_s26 = scalar_lea.vmem [#allocation6], %s2016_s21 }
  0x9c   : > { %p3581_p12 = scmp.ne.s32.totalorder %s3580_s19, 0 }
  0x9e   : > { %2708 = dma.done.wait (%p3581_p12), %s330_s11, 1024  }
  0x9f   : > { %2710 = vsyncadd (%p3581_p12), %s330_s11, 4294966272  ;;  %s3582_s16 = sld [smem:[#allocation15_spill]] }
  0xa0   : > { %s3583_s10 = sld [smem:[#allocation25_spill]] }
  0xa5   : > { %s3083_s28 = sand.u32 1, %s3582_s16  }
  0xa6   : > { %s2017_s14 = sshll.u32 %s3083_s28, 8  ;;  %p3584_p8 = scmp.ne.s32.totalorder %s3583_s10, 0 }
  0xa7   : > { %s3086_s12 = scalar_lea.vmem [#allocation8], %s2017_s14 }
  0xa8   : > { %2712 = dma.done.wait (%p3584_p8), %s330_s11, 4096  }
  0xa9   : > { %2714 = vsyncadd (%p3584_p8), %s330_s11, 4294963200  ;;  %s2018_s7 = sshll.u32 %s3083_s28, 9  ;;  %s3585_s17 = sld [smem:[#allocation17_spill]] }
  0xaa   : > { %s3093_s15 = scalar_lea.vmem [#allocation9], %s2018_s7 }
  0xaf   : > { %p2019_p5 = scmp.ne.s32.totalorder %s3585_s17, 0 }
  0xb1   : > { %411 = sbr.rel (%p2019_p5) target bundleno = 215 (0xd7), region = 56 }
  0xb6   : > { %v2785_v0 = vmov 0.0  }
  0xb7   : > { %412 = vst [vmem:[#allocation2 + $0xb0] sm:$0xff] %v2785_v0  ;;  %413 = vst [vmem:[#allocation2 + $0x1b0] sm:$0xff] %v2785_v0 }
  0xb8   : > { %414 = vst [vmem:[#allocation2 + $0xd8] sm:$0xff] %v2785_v0  ;;  %415 = vst [vmem:[#allocation2 + $0x18] sm:$0xff] %v2785_v0 }
  0xb9   : > { %416 = vst [vmem:[#allocation2 + $0x50] sm:$0xff] %v2785_v0  ;;  %417 = vst [vmem:[#allocation2 + $0x168] sm:$0xff] %v2785_v0 }
  0xba   : > { %418 = vst [vmem:[#allocation2 + $0x130] sm:$0xff] %v2785_v0  ;;  %419 = vst [vmem:[#allocation2 + $0x48] sm:$0xff] %v2785_v0 }
  0xbb   : > { %420 = vst [vmem:[#allocation2 + $0x180] sm:$0xff] %v2785_v0  ;;  %421 = vst [vmem:[#allocation2 + $0x110] sm:$0xff] %v2785_v0 }
  0xbc   : > { %422 = vst [vmem:[#allocation2 + $0x118] sm:$0xff] %v2785_v0  ;;  %423 = vst [vmem:[#allocation2 + $0x98] sm:$0xff] %v2785_v0 }
  0xbd   : > { %424 = vst [vmem:[#allocation2 + $0x120] sm:$0xff] %v2785_v0  ;;  %425 = vst [vmem:[#allocation2 + $0x150] sm:$0xff] %v2785_v0 }
  0xbe   : > { %426 = vst [vmem:[#allocation2 + $0x108] sm:$0xff] %v2785_v0  ;;  %427 = vst [vmem:[#allocation2 + $0x60] sm:$0xff] %v2785_v0 }
  0xbf   : > { %428 = vst [vmem:[#allocation2 + $0xe0] sm:$0xff] %v2785_v0  ;;  %429 = vst [vmem:[#allocation2 + $0x188] sm:$0xff] %v2785_v0 }
  0xc0   : > { %430 = vst [vmem:[#allocation2 + $0x138] sm:$0xff] %v2785_v0  ;;  %431 = vst [vmem:[#allocation2 + $0x140] sm:$0xff] %v2785_v0 }
  0xc1   : > { %432 = vst [vmem:[#allocation2 + $0x80] sm:$0xff] %v2785_v0  ;;  %433 = vst [vmem:[#allocation2 + $0x1a8] sm:$0xff] %v2785_v0 }
  0xc2   : > { %434 = vst [vmem:[#allocation2 + $0x1b8] sm:$0xff] %v2785_v0  ;;  %435 = vst [vmem:[#allocation2 + $0x28] sm:$0xff] %v2785_v0 }
  0xc3   : > { %436 = vst [vmem:[#allocation2 + $0x1e8] sm:$0xff] %v2785_v0  ;;  %437 = vst [vmem:[#allocation2 + $0xf8] sm:$0xff] %v2785_v0 }
  0xc4   : > { %438 = vst [vmem:[#allocation2 + $0x160] sm:$0xff] %v2785_v0  ;;  %439 = vst [vmem:[#allocation2 + $0x30] sm:$0xff] %v2785_v0 }
  0xc5   : > { %440 = vst [vmem:[#allocation2 + $0x1e0] sm:$0xff] %v2785_v0  ;;  %441 = vst [vmem:[#allocation2] sm:$0xff] %v2785_v0 }
  0xc6   : > { %442 = vst [vmem:[#allocation2 + $0xf0] sm:$0xff] %v2785_v0  ;;  %443 = vst [vmem:[#allocation2 + $0x8] sm:$0xff] %v2785_v0 }
  0xc7   : > { %444 = vst [vmem:[#allocation2 + $0x148] sm:$0xff] %v2785_v0  ;;  %445 = vst [vmem:[#allocation2 + $0x1d0] sm:$0xff] %v2785_v0 }
  0xc8   : > { %446 = vst [vmem:[#allocation2 + $0x100] sm:$0xff] %v2785_v0  ;;  %447 = vst [vmem:[#allocation2 + $0xc8] sm:$0xff] %v2785_v0 }
  0xc9   : > { %448 = vst [vmem:[#allocation2 + $0x40] sm:$0xff] %v2785_v0  ;;  %449 = vst [vmem:[#allocation2 + $0x1f8] sm:$0xff] %v2785_v0 }
  0xca   : > { %450 = vst [vmem:[#allocation2 + $0x20] sm:$0xff] %v2785_v0  ;;  %451 = vst [vmem:[#allocation2 + $0x128] sm:$0xff] %v2785_v0 }
  0xcb   : > { %452 = vst [vmem:[#allocation2 + $0x1a0] sm:$0xff] %v2785_v0  ;;  %453 = vst [vmem:[#allocation2 + $0x1f0] sm:$0xff] %v2785_v0 }
  0xcc   : > { %454 = vst [vmem:[#allocation2 + $0xe8] sm:$0xff] %v2785_v0  ;;  %455 = vst [vmem:[#allocation2 + $0x78] sm:$0xff] %v2785_v0 }
  0xcd   : > { %456 = vst [vmem:[#allocation2 + $0x70] sm:$0xff] %v2785_v0  ;;  %457 = vst [vmem:[#allocation2 + $0x90] sm:$0xff] %v2785_v0 }
  0xce   : > { %458 = vst [vmem:[#allocation2 + $0x1d8] sm:$0xff] %v2785_v0  ;;  %459 = vst [vmem:[#allocation2 + $0xd0] sm:$0xff] %v2785_v0 }
  0xcf   : > { %460 = vst [vmem:[#allocation2 + $0xb8] sm:$0xff] %v2785_v0  ;;  %461 = vst [vmem:[#allocation2 + $0x88] sm:$0xff] %v2785_v0 }
  0xd0   : > { %462 = vst [vmem:[#allocation2 + $0xa8] sm:$0xff] %v2785_v0  ;;  %463 = vst [vmem:[#allocation2 + $0x1c8] sm:$0xff] %v2785_v0 }
  0xd1   : > { %464 = vst [vmem:[#allocation2 + $0x170] sm:$0xff] %v2785_v0  ;;  %465 = vst [vmem:[#allocation2 + $0x178] sm:$0xff] %v2785_v0 }
  0xd2   : > { %466 = vst [vmem:[#allocation2 + $0x68] sm:$0xff] %v2785_v0  ;;  %467 = vst [vmem:[#allocation2 + $0x190] sm:$0xff] %v2785_v0 }
  0xd3   : > { %468 = vst [vmem:[#allocation2 + $0x198] sm:$0xff] %v2785_v0  ;;  %469 = vst [vmem:[#allocation2 + $0x38] sm:$0xff] %v2785_v0 }
  0xd4   : > { %470 = vst [vmem:[#allocation2 + $0xc0] sm:$0xff] %v2785_v0  ;;  %471 = vst [vmem:[#allocation2 + $0x1c0] sm:$0xff] %v2785_v0 }
  0xd5   : > { %472 = vst [vmem:[#allocation2 + $0x158] sm:$0xff] %v2785_v0  ;;  %473 = vst [vmem:[#allocation2 + $0x10] sm:$0xff] %v2785_v0 }
  0xd6   : > { %474 = vst [vmem:[#allocation2 + $0x58] sm:$0xff] %v2785_v0  ;;  %475 = vst [vmem:[#allocation2 + $0xa0] sm:$0xff] %v2785_v0 }
  0xd7 PF: > { %v2503_v1 = vld [vmem:[%s3076_s26 + $0x38] sm:$0xff]   ;;  %v2504_v2 = vld [vmem:[%s3076_s26 + $0x30] sm:$0xff]   ;;  %v2505_v3 = vld [vmem:[%s3076_s26 + $0x28] sm:$0xff]   ;;  %s3586_s27 = sld [smem:[#allocation17_spill]] }
  0xd8   : > { %2275 = vmatprep.subr.bf16.mxu0 %v2503_v1  ;;  %2355 = vmatprep.subr.bf16.mxu1 %v2503_v1  ;;  %v2506_v4 = vld [vmem:[%s3076_s26 + $0x20] sm:$0xff]   ;;  %v2507_v7 = vld [vmem:[%s3076_s26 + $0x18] sm:$0xff]   ;;  %v2508_v8 = vld [vmem:[%s3076_s26 + $0x10] sm:$0xff]  }
  0xd9   : > { %2276 = vmatpush3.bf16.msra.mxu0 %v2503_v1  ;;  %2363 = vmatpush3.bf16.msra.mxu1 %v2503_v1  ;;  %v2511_v5 = vld [vmem:[%s3068_s0] sm:$0xff]   ;;  %v2509_v9 = vld [vmem:[%s3076_s26 + $0x8] sm:$0xff]   ;;  %v2515_v13 = vld [vmem:[%s3068_s0 + $0x10] sm:$0xff]  }
  0xda   : > { %2277 = vmatprep.subr.bf16.mxu0 %v2504_v2  ;;  %2356 = vmatprep.subr.bf16.mxu1 %v2504_v2  ;;  %v2512_v6 = vld [vmem:[%s3068_s0 + $0x80] sm:$0xff]   ;;  %v2513_v11 = vld [vmem:[%s3068_s0 + $0x8] sm:$0xff]   ;;  %v2516_v14 = vld [vmem:[%s3068_s0 + $0x90] sm:$0xff]  }
  0xdb   : > { %2291 = vmatprep.mubr.bf16.mxu0 %v2511_v5  ;;  %2323 = vmatprep.mubr.bf16.mxu1 %v2512_v6  ;;  %v2510_v10 = vld [vmem:[%s3076_s26] sm:$0xff]   ;;  %v2514_v12 = vld [vmem:[%s3068_s0 + $0x88] sm:$0xff]   ;;  %v2517_v15 = vld [vmem:[%s3068_s0 + $0x18] sm:$0xff]  }
  0xdc   : > { %v2518_v16 = vld [vmem:[%s3068_s0 + $0x98] sm:$0xff]   ;;  %v2519_v17 = vld [vmem:[%s3068_s0 + $0x20] sm:$0xff]   ;;  %v2521_v19 = vld [vmem:[%s3068_s0 + $0x28] sm:$0xff]  }
  0xdd   : > { %2278 = vmatpush3.bf16.msra.mxu0 %v2504_v2  ;;  %2364 = vmatpush3.bf16.msra.mxu1 %v2504_v2  ;;  %v2520_v18 = vld [vmem:[%s3068_s0 + $0xa0] sm:$0xff]   ;;  %v2522_v20 = vld [vmem:[%s3068_s0 + $0xa8] sm:$0xff]   ;;  %v2523_v21 = vld [vmem:[%s3068_s0 + $0x30] sm:$0xff]   ;;  %p2060_p13 = scmp.ne.s32.totalorder %s3586_s27, 1 }
  0xde   : > { %2279 = vmatprep.subr.bf16.mxu0 %v2505_v3  ;;  %2357 = vmatprep.subr.bf16.mxu1 %v2505_v3  ;;  %v2524_v22 = vld [vmem:[%s3068_s0 + $0xb0] sm:$0xff]   ;;  %v2525_v23 = vld [vmem:[%s3068_s0 + $0x38] sm:$0xff]   ;;  %v2527_v25 = vld [vmem:[%s3068_s0 + $0x40] sm:$0xff]   ;;  %s3587_s18 = sld [smem:[#allocation29_spill]] (!%p2060_p13) }
  0xdf   : > { %v2526_v24 = vld [vmem:[%s3068_s0 + $0xb8] sm:$0xff]   ;;  %v2528_v26 = vld [vmem:[%s3068_s0 + $0xc0] sm:$0xff]   ;;  %v2529_v27 = vld [vmem:[%s3068_s0 + $0x48] sm:$0xff]   ;;  %s3588_s3 = sld [smem:[#allocation30_spill]] (!%p2060_p13) }
  0xe0   : > { %v2530_v28 = vld [vmem:[%s3068_s0 + $0xc8] sm:$0xff]   ;;  %v2531_v29 = vld [vmem:[%s3068_s0 + $0x50] sm:$0xff]   ;;  %v2533_v31 = vld [vmem:[%s3068_s0 + $0x58] sm:$0xff]  }
  0xe1   : > { %2280 = vmatpush3.bf16.msra.mxu0 %v2505_v3  ;;  %2365 = vmatpush3.bf16.msra.mxu1 %v2505_v3  ;;  %v2532_v30 = vld [vmem:[%s3068_s0 + $0xd0] sm:$0xff]   ;;  %v2534_v32 = vld [vmem:[%s3068_s0 + $0xd8] sm:$0xff]   ;;  %v2535_v33 = vld [vmem:[%s3068_s0 + $0x60] sm:$0xff]  }
  0xe2   : > { %2281 = vmatprep.subr.bf16.mxu0 %v2506_v4  ;;  %2358 = vmatprep.subr.bf16.mxu1 %v2506_v4  ;;  %v2536_v34 = vld [vmem:[%s3068_s0 + $0xe0] sm:$0xff]   ;;  %v2537_v35 = vld [vmem:[%s3068_s0 + $0x68] sm:$0xff]   ;;  %v2539_v37 = vld [vmem:[%s3068_s0 + $0x70] sm:$0xff]  }
  0xe3   : > { %v2538_v36 = vld [vmem:[%s3068_s0 + $0xe8] sm:$0xff]   ;;  %v2540_v38 = vld [vmem:[%s3068_s0 + $0xf0] sm:$0xff]   ;;  %v2541_v39 = vld [vmem:[%s3068_s0 + $0x78] sm:$0xff]  }
  0xe4   : > { %v2542_v40 = vld [vmem:[%s3068_s0 + $0xf8] sm:$0xff]   ;;  %v574_v42 = vld [vmem:[#allocation2 + $0x100] sm:$0xff]  ;;  %v540_v45 = vld [vmem:[#allocation2 + $0xb0] sm:$0xff] }
  0xe5   : > { %2282 = vmatpush3.bf16.msra.mxu0 %v2506_v4  ;;  %2366 = vmatpush3.bf16.msra.mxu1 %v2506_v4  ;;  %v542_v41 = vld [vmem:[#allocation2 + $0xd8] sm:$0xff]  ;;  %v572_v46 = vld [vmem:[#allocation2 + $0x148] sm:$0xff]  ;;  %v541_v57 = vld [vmem:[#allocation2 + $0x1b0] sm:$0xff] }
  0xe6   : > { %2283 = vmatprep.subr.bf16.mxu0 %v2507_v7  ;;  %2359 = vmatprep.subr.bf16.mxu1 %v2507_v7  ;;  %v543_v51 = vld [vmem:[#allocation2 + $0x18] sm:$0xff]  ;;  %v575_v52 = vld [vmem:[#allocation2 + $0xc8] sm:$0xff]  ;;  %v573_v58 = vld [vmem:[#allocation2 + $0x1d0] sm:$0xff] }
  0xe7   : > { %v546_v63 = vld [vmem:[#allocation2 + $0x130] sm:$0xff]  ;;  %v578_v0 = vld [vmem:[#allocation2 + $0x20] sm:$0xff] }
  0xe8   : > { %v544_v5 = vld [vmem:[#allocation2 + $0x50] sm:$0xff]  ;;  %v576_v6 = vld [vmem:[#allocation2 + $0x40] sm:$0xff] }
  0xe9   : > { %2284 = vmatpush3.bf16.msra.mxu0 %v2507_v7  ;;  %2367 = vmatpush3.bf16.msra.mxu1 %v2507_v7 }
  0xea   : > { %2285 = vmatprep.subr.bf16.mxu0 %v2508_v8  ;;  %2360 = vmatprep.subr.bf16.mxu1 %v2508_v8 }
  0xed   : > { %2286 = vmatpush3.bf16.msra.mxu0 %v2508_v8  ;;  %2368 = vmatpush3.bf16.msra.mxu1 %v2508_v8 }
  0xee   : > { %2287 = vmatprep.subr.bf16.mxu0 %v2509_v9  ;;  %2361 = vmatprep.subr.bf16.mxu1 %v2509_v9 }
  0xf1   : > { %2288 = vmatpush3.bf16.msra.mxu0 %v2509_v9  ;;  %2369 = vmatpush3.bf16.msra.mxu1 %v2509_v9 }
  0xf2   : > { %2289 = vmatprep.subr.bf16.mxu0 %v2510_v10  ;;  %2362 = vmatprep.subr.bf16.mxu1 %v2510_v10 }
  0xf5   : > { %2290 = vmatpush3.bf16.msra.mxu0 %v2510_v10  ;;  %2370 = vmatpush3.bf16.msra.mxu1 %v2510_v10 }
  0xf8   : > { %2292 = vmatmul.mubr.bf16.vlgmr.msra.gmra.mxu0 %v2513_v11  ;;  %2324 = vmatmul.mubr.bf16.vlgmr.msra.gmra.mxu1 %v2514_v12  ;;  %v547_v11 = vld [vmem:[#allocation2 + $0x48] sm:$0xff] }
  0xf9   : > { %2295 = vmatprep.mubr.bf16.mxu0 %v2515_v13  ;;  %2327 = vmatprep.mubr.bf16.mxu1 %v2516_v14  ;;  %v579_v12 = vld [vmem:[#allocation2 + $0x128] sm:$0xff] }
 0x100   : > { %2296 = vmatmul.mubr.bf16.gmra.mxu0 %v2517_v15  ;;  %2328 = vmatmul.mubr.bf16.gmra.mxu1 %v2518_v16 }
 0x101   : > { %2299 = vmatprep.mubr.bf16.mxu0 %v2519_v17  ;;  %2331 = vmatprep.mubr.bf16.mxu1 %v2520_v18  ;;  %v545_v17 = vld [vmem:[#allocation2 + $0x168] sm:$0xff]  ;;  %v577_v18 = vld [vmem:[#allocation2 + $0x1f8] sm:$0xff] }
 0x108   : > { %2300 = vmatmul.mubr.bf16.gmra.mxu0 %v2521_v19  ;;  %2332 = vmatmul.mubr.bf16.gmra.mxu1 %v2522_v20 }
 0x109   : > { %2303 = vmatprep.mubr.bf16.mxu0 %v2523_v21  ;;  %2335 = vmatprep.mubr.bf16.mxu1 %v2524_v22 }
 0x110   : > { %2304 = vmatmul.mubr.bf16.gmra.mxu0 %v2525_v23  ;;  %2336 = vmatmul.mubr.bf16.gmra.mxu1 %v2526_v24  ;;  %v550_v23 = vld [vmem:[#allocation2 + $0x118] sm:$0xff]  ;;  %v582_v24 = vld [vmem:[#allocation2 + $0xe8] sm:$0xff] }
 0x111   : > { %2307 = vmatprep.mubr.bf16.mxu0 %v2527_v25  ;;  %2339 = vmatprep.mubr.bf16.mxu1 %v2528_v26 }
 0x118   : > { %2308 = vmatmul.mubr.bf16.gmra.mxu0 %v2529_v27  ;;  %2340 = vmatmul.mubr.bf16.gmra.mxu1 %v2530_v28 }
 0x119   : > { %2311 = vmatprep.mubr.bf16.mxu0 %v2531_v29  ;;  %2343 = vmatprep.mubr.bf16.mxu1 %v2532_v30  ;;  %v548_v29 = vld [vmem:[#allocation2 + $0x180] sm:$0xff] }
 0x11a   : > { %v580_v30 = vld [vmem:[#allocation2 + $0x1a0] sm:$0xff] }
 0x120   : > { %2312 = vmatmul.mubr.bf16.gmra.mxu0 %v2533_v31  ;;  %2344 = vmatmul.mubr.bf16.gmra.mxu1 %v2534_v32 }
 0x121   : > { %2315 = vmatprep.mubr.bf16.mxu0 %v2535_v33  ;;  %2347 = vmatprep.mubr.bf16.mxu1 %v2536_v34 }
 0x128   : > { %2316 = vmatmul.mubr.bf16.gmra.mxu0 %v2537_v35  ;;  %2348 = vmatmul.mubr.bf16.gmra.mxu1 %v2538_v36  ;;  %v551_v35 = vld [vmem:[#allocation2 + $0x98] sm:$0xff] }
 0x129   : > { %2319 = vmatprep.mubr.bf16.mxu0 %v2539_v37  ;;  %2351 = vmatprep.mubr.bf16.mxu1 %v2540_v38  ;;  %v583_v36 = vld [vmem:[#allocation2 + $0x78] sm:$0xff] }
 0x130   : > { %2320 = vmatmul.mubr.bf16.gmra.mxu0 %v2541_v39  ;;  %2352 = vmatmul.mubr.bf16.gmra.mxu1 %v2542_v40 }
 0x1b8   : > { %v2293_v43 = vpop.f32.mrf.mxu0  ;;  %v2325_v44 = vpop.f32.mrf.mxu1 }
 0x1b9   : > { %v1151_v47 = vadd.f32 %v2293_v43, %v542_v41  ;;  %v1183_v48 = vadd.f32 %v2325_v44, %v574_v42  ;;  %v549_v41 = vld [vmem:[#allocation2 + $0x110] sm:$0xff] }
 0x1ba   : > { %v894_v49 = vpop.f32.mrf.mxu0  ;;  %v1022_v50 = vpop.f32.mrf.mxu1  ;;  %v581_v42 = vld [vmem:[#allocation2 + $0x1f0] sm:$0xff] }
 0x1bb   : > { %1215 = vst [vmem:[#allocation2 + $0xd8] sm:$0xff] %v1151_v47  ;;  %1247 = vst [vmem:[#allocation2 + $0x100] sm:$0xff] %v1183_v48  ;;  %v1149_v53 = vadd.f32 %v894_v49, %v540_v45  ;;  %v1181_v54 = vadd.f32 %v1022_v50, %v572_v46  ;;  %v554_v47 = vld [vmem:[#allocation2 + $0x108] sm:$0xff]  ;;  %v586_v48 = vld [vmem:[#allocation2 + $0x1d8] sm:$0xff] }
 0x1bc   : > { %v2294_v55 = vpop.f32.mrf.mxu0  ;;  %v2326_v56 = vpop.f32.mrf.mxu1 }
 0x1bd   : > { %1213 = vst [vmem:[#allocation2 + $0xb0] sm:$0xff] %v1149_v53  ;;  %1245 = vst [vmem:[#allocation2 + $0x148] sm:$0xff] %v1181_v54  ;;  %v1152_v59 = vadd.f32 %v2294_v55, %v543_v51  ;;  %v1184_v60 = vadd.f32 %v2326_v56, %v575_v52  ;;  %v552_v53 = vld [vmem:[#allocation2 + $0x120] sm:$0xff]  ;;  %v584_v54 = vld [vmem:[#allocation2 + $0x70] sm:$0xff] }
 0x1be   : > { %v897_v61 = vpop.f32.mrf.mxu0  ;;  %v1025_v62 = vpop.f32.mrf.mxu1 }
 0x1bf   : > { %1216 = vst [vmem:[#allocation2 + $0x18] sm:$0xff] %v1152_v59  ;;  %1248 = vst [vmem:[#allocation2 + $0xc8] sm:$0xff] %v1184_v60  ;;  %v1150_v1 = vadd.f32 %v897_v61, %v541_v57  ;;  %v1182_v2 = vadd.f32 %v1025_v62, %v573_v58  ;;  %v555_v59 = vld [vmem:[#allocation2 + $0x60] sm:$0xff]  ;;  %v587_v60 = vld [vmem:[#allocation2 + $0xd0] sm:$0xff] }
 0x1c0   : > { %v2297_v3 = vpop.f32.mrf.mxu0  ;;  %v2329_v4 = vpop.f32.mrf.mxu1 }
 0x1c1   : > { %1214 = vst [vmem:[#allocation2 + $0x1b0] sm:$0xff] %v1150_v1  ;;  %1246 = vst [vmem:[#allocation2 + $0x1d0] sm:$0xff] %v1182_v2  ;;  %v1155_v7 = vadd.f32 %v2297_v3, %v546_v63  ;;  %v1187_v8 = vadd.f32 %v2329_v4, %v578_v0  ;;  %v553_v1 = vld [vmem:[#allocation2 + $0x150] sm:$0xff] }
 0x1c2   : > { %v910_v9 = vpop.f32.mrf.mxu0  ;;  %v1038_v10 = vpop.f32.mrf.mxu1  ;;  %v585_v2 = vld [vmem:[#allocation2 + $0x90] sm:$0xff] }
 0x1c3   : > { %1219 = vst [vmem:[#allocation2 + $0x130] sm:$0xff] %v1155_v7  ;;  %1251 = vst [vmem:[#allocation2 + $0x20] sm:$0xff] %v1187_v8  ;;  %v1153_v13 = vadd.f32 %v910_v9, %v544_v5  ;;  %v1185_v14 = vadd.f32 %v1038_v10, %v576_v6  ;;  %v558_v7 = vld [vmem:[#allocation2 + $0x138] sm:$0xff]  ;;  %v590_v8 = vld [vmem:[#allocation2 + $0xa8] sm:$0xff] }
 0x1c4   : > { %v2298_v15 = vpop.f32.mrf.mxu0  ;;  %v2330_v16 = vpop.f32.mrf.mxu1 }
 0x1c5   : > { %1217 = vst [vmem:[#allocation2 + $0x50] sm:$0xff] %v1153_v13  ;;  %1249 = vst [vmem:[#allocation2 + $0x40] sm:$0xff] %v1185_v14  ;;  %v1156_v19 = vadd.f32 %v2298_v15, %v547_v11  ;;  %v1188_v20 = vadd.f32 %v2330_v16, %v579_v12  ;;  %v556_v13 = vld [vmem:[#allocation2 + $0xe0] sm:$0xff]  ;;  %v588_v14 = vld [vmem:[#allocation2 + $0xb8] sm:$0xff] }
 0x1c6   : > { %v913_v21 = vpop.f32.mrf.mxu0  ;;  %v1041_v22 = vpop.f32.mrf.mxu1 }
 0x1c7   : > { %1220 = vst [vmem:[#allocation2 + $0x48] sm:$0xff] %v1156_v19  ;;  %1252 = vst [vmem:[#allocation2 + $0x128] sm:$0xff] %v1188_v20  ;;  %v1154_v25 = vadd.f32 %v913_v21, %v545_v17  ;;  %v1186_v26 = vadd.f32 %v1041_v22, %v577_v18  ;;  %v559_v19 = vld [vmem:[#allocation2 + $0x140] sm:$0xff]  ;;  %v591_v20 = vld [vmem:[#allocation2 + $0x1c8] sm:$0xff] }
 0x1c8   : > { %v2301_v27 = vpop.f32.mrf.mxu0  ;;  %v2333_v28 = vpop.f32.mrf.mxu1 }
 0x1c9   : > { %1218 = vst [vmem:[#allocation2 + $0x168] sm:$0xff] %v1154_v25  ;;  %1250 = vst [vmem:[#allocation2 + $0x1f8] sm:$0xff] %v1186_v26  ;;  %v1159_v31 = vadd.f32 %v2301_v27, %v550_v23  ;;  %v1191_v32 = vadd.f32 %v2333_v28, %v582_v24  ;;  %v557_v25 = vld [vmem:[#allocation2 + $0x188] sm:$0xff] }
 0x1ca   : > { %v926_v33 = vpop.f32.mrf.mxu0  ;;  %v1054_v34 = vpop.f32.mrf.mxu1  ;;  %v589_v26 = vld [vmem:[#allocation2 + $0x88] sm:$0xff] }
 0x1cb   : > { %1223 = vst [vmem:[#allocation2 + $0x118] sm:$0xff] %v1159_v31  ;;  %1255 = vst [vmem:[#allocation2 + $0xe8] sm:$0xff] %v1191_v32  ;;  %v1157_v37 = vadd.f32 %v926_v33, %v548_v29  ;;  %v1189_v38 = vadd.f32 %v1054_v34, %v580_v30  ;;  %v562_v31 = vld [vmem:[#allocation2 + $0x1b8] sm:$0xff]  ;;  %v594_v32 = vld [vmem:[#allocation2 + $0x68] sm:$0xff] }
 0x1cc   : > { %v2302_v39 = vpop.f32.mrf.mxu0  ;;  %v2334_v40 = vpop.f32.mrf.mxu1 }
 0x1cd   : > { %1221 = vst [vmem:[#allocation2 + $0x180] sm:$0xff] %v1157_v37  ;;  %1253 = vst [vmem:[#allocation2 + $0x1a0] sm:$0xff] %v1189_v38  ;;  %v1160_v43 = vadd.f32 %v2302_v39, %v551_v35  ;;  %v1192_v44 = vadd.f32 %v2334_v40, %v583_v36  ;;  %v560_v37 = vld [vmem:[#allocation2 + $0x80] sm:$0xff]  ;;  %v592_v38 = vld [vmem:[#allocation2 + $0x170] sm:$0xff] }
 0x1ce   : > { %v929_v45 = vpop.f32.mrf.mxu0  ;;  %v1057_v46 = vpop.f32.mrf.mxu1 }
 0x1cf   : > { %1224 = vst [vmem:[#allocation2 + $0x98] sm:$0xff] %v1160_v43  ;;  %1256 = vst [vmem:[#allocation2 + $0x78] sm:$0xff] %v1192_v44  ;;  %v1158_v49 = vadd.f32 %v929_v45, %v549_v41  ;;  %v1190_v50 = vadd.f32 %v1057_v46, %v581_v42  ;;  %v563_v43 = vld [vmem:[#allocation2 + $0x28] sm:$0xff]  ;;  %v595_v44 = vld [vmem:[#allocation2 + $0x190] sm:$0xff] }
 0x1d0   : > { %v2305_v51 = vpop.f32.mrf.mxu0  ;;  %v2337_v52 = vpop.f32.mrf.mxu1 }
 0x1d1   : > { %1222 = vst [vmem:[#allocation2 + $0x110] sm:$0xff] %v1158_v49  ;;  %1254 = vst [vmem:[#allocation2 + $0x1f0] sm:$0xff] %v1190_v50  ;;  %v1163_v55 = vadd.f32 %v2305_v51, %v554_v47  ;;  %v1195_v56 = vadd.f32 %v2337_v52, %v586_v48  ;;  %v561_v49 = vld [vmem:[#allocation2 + $0x1a8] sm:$0xff]  ;;  %v593_v50 = vld [vmem:[#allocation2 + $0x178] sm:$0xff] }
 0x1d2   : > { %v942_v57 = vpop.f32.mrf.mxu0  ;;  %v1070_v58 = vpop.f32.mrf.mxu1 }
 0x1d3   : > { %1227 = vst [vmem:[#allocation2 + $0x108] sm:$0xff] %v1163_v55  ;;  %1259 = vst [vmem:[#allocation2 + $0x1d8] sm:$0xff] %v1195_v56  ;;  %v1161_v61 = vadd.f32 %v942_v57, %v552_v53  ;;  %v1193_v62 = vadd.f32 %v1070_v58, %v584_v54  ;;  %v566_v55 = vld [vmem:[#allocation2 + $0x160] sm:$0xff] }
 0x1d4   : > { %v2306_v63 = vpop.f32.mrf.mxu0  ;;  %v2338_v0 = vpop.f32.mrf.mxu1  ;;  %v598_v56 = vld [vmem:[#allocation2 + $0xc0] sm:$0xff] }
 0x1d5   : > { %1225 = vst [vmem:[#allocation2 + $0x120] sm:$0xff] %v1161_v61  ;;  %1257 = vst [vmem:[#allocation2 + $0x70] sm:$0xff] %v1193_v62  ;;  %v1164_v3 = vadd.f32 %v2306_v63, %v555_v59  ;;  %v1196_v4 = vadd.f32 %v2338_v0, %v587_v60  ;;  %v564_v61 = vld [vmem:[#allocation2 + $0x1e8] sm:$0xff]  ;;  %v596_v62 = vld [vmem:[#allocation2 + $0x198] sm:$0xff] }
 0x1d6   : > { %v945_v5 = vpop.f32.mrf.mxu0  ;;  %v1073_v6 = vpop.f32.mrf.mxu1 }
 0x1d7   : > { %1228 = vst [vmem:[#allocation2 + $0x60] sm:$0xff] %v1164_v3  ;;  %1260 = vst [vmem:[#allocation2 + $0xd0] sm:$0xff] %v1196_v4  ;;  %v1162_v9 = vadd.f32 %v945_v5, %v553_v1  ;;  %v1194_v10 = vadd.f32 %v1073_v6, %v585_v2  ;;  %v567_v3 = vld [vmem:[#allocation2 + $0x30] sm:$0xff]  ;;  %v599_v4 = vld [vmem:[#allocation2 + $0x1c0] sm:$0xff] }
 0x1d8   : > { %v2309_v11 = vpop.f32.mrf.mxu0  ;;  %v2341_v12 = vpop.f32.mrf.mxu1 }
 0x1d9   : > { %1226 = vst [vmem:[#allocation2 + $0x150] sm:$0xff] %v1162_v9  ;;  %1258 = vst [vmem:[#allocation2 + $0x90] sm:$0xff] %v1194_v10  ;;  %v1167_v15 = vadd.f32 %v2309_v11, %v558_v7  ;;  %v1199_v16 = vadd.f32 %v2341_v12, %v590_v8  ;;  %v565_v9 = vld [vmem:[#allocation2 + $0xf8] sm:$0xff] }
 0x1da   : > { %v958_v17 = vpop.f32.mrf.mxu0  ;;  %v1086_v18 = vpop.f32.mrf.mxu1  ;;  %v597_v10 = vld [vmem:[#allocation2 + $0x38] sm:$0xff] }
 0x1db   : > { %1231 = vst [vmem:[#allocation2 + $0x138] sm:$0xff] %v1167_v15  ;;  %1263 = vst [vmem:[#allocation2 + $0xa8] sm:$0xff] %v1199_v16  ;;  %v1165_v21 = vadd.f32 %v958_v17, %v556_v13  ;;  %v1197_v22 = vadd.f32 %v1086_v18, %v588_v14  ;;  %v570_v15 = vld [vmem:[#allocation2 + $0xf0] sm:$0xff]  ;;  %v602_v16 = vld [vmem:[#allocation2 + $0x58] sm:$0xff] }
 0x1dc   : > { %v2310_v23 = vpop.f32.mrf.mxu0  ;;  %v2342_v24 = vpop.f32.mrf.mxu1 }
 0x1dd   : > { %1229 = vst [vmem:[#allocation2 + $0xe0] sm:$0xff] %v1165_v21  ;;  %1261 = vst [vmem:[#allocation2 + $0xb8] sm:$0xff] %v1197_v22  ;;  %v1168_v27 = vadd.f32 %v2310_v23, %v559_v19  ;;  %v1200_v28 = vadd.f32 %v2342_v24, %v591_v20  ;;  %v568_v21 = vld [vmem:[#allocation2 + $0x1e0] sm:$0xff]  ;;  %v600_v22 = vld [vmem:[#allocation2 + $0x158] sm:$0xff] }
 0x1de   : > { %v961_v29 = vpop.f32.mrf.mxu0  ;;  %v1089_v30 = vpop.f32.mrf.mxu1 }
 0x1df   : > { %1232 = vst [vmem:[#allocation2 + $0x140] sm:$0xff] %v1168_v27  ;;  %1264 = vst [vmem:[#allocation2 + $0x1c8] sm:$0xff] %v1200_v28  ;;  %v1166_v33 = vadd.f32 %v961_v29, %v557_v25  ;;  %v1198_v34 = vadd.f32 %v1089_v30, %v589_v26  ;;  %v571_v27 = vld [vmem:[#allocation2 + $0x8] sm:$0xff]  ;;  %v603_v28 = vld [vmem:[#allocation2 + $0xa0] sm:$0xff] }
 0x1e0   : > { %v2313_v35 = vpop.f32.mrf.mxu0  ;;  %v2345_v36 = vpop.f32.mrf.mxu1 }
 0x1e1   : > { %1230 = vst [vmem:[#allocation2 + $0x188] sm:$0xff] %v1166_v33  ;;  %1262 = vst [vmem:[#allocation2 + $0x88] sm:$0xff] %v1198_v34  ;;  %v1171_v39 = vadd.f32 %v2313_v35, %v562_v31  ;;  %v1203_v40 = vadd.f32 %v2345_v36, %v594_v32  ;;  %v569_v33 = vld [vmem:[#allocation2] sm:$0xff]  ;;  %v601_v34 = vld [vmem:[#allocation2 + $0x10] sm:$0xff] }
 0x1e2   : > { %v974_v41 = vpop.f32.mrf.mxu0  ;;  %v1102_v42 = vpop.f32.mrf.mxu1 }
 0x1e3   : > { %1235 = vst [vmem:[#allocation2 + $0x1b8] sm:$0xff] %v1171_v39  ;;  %1267 = vst [vmem:[#allocation2 + $0x68] sm:$0xff] %v1203_v40  ;;  %v1169_v45 = vadd.f32 %v974_v41, %v560_v37  ;;  %v1201_v46 = vadd.f32 %v1102_v42, %v592_v38 }
 0x1e4   : > { %v2314_v47 = vpop.f32.mrf.mxu0  ;;  %v2346_v48 = vpop.f32.mrf.mxu1 }
 0x1e5   : > { %1233 = vst [vmem:[#allocation2 + $0x80] sm:$0xff] %v1169_v45  ;;  %1265 = vst [vmem:[#allocation2 + $0x170] sm:$0xff] %v1201_v46  ;;  %v1172_v51 = vadd.f32 %v2314_v47, %v563_v43  ;;  %v1204_v52 = vadd.f32 %v2346_v48, %v595_v44 }
 0x1e6   : > { %v977_v53 = vpop.f32.mrf.mxu0  ;;  %v1105_v54 = vpop.f32.mrf.mxu1 }
 0x1e7   : > { %1236 = vst [vmem:[#allocation2 + $0x28] sm:$0xff] %v1172_v51  ;;  %1268 = vst [vmem:[#allocation2 + $0x190] sm:$0xff] %v1204_v52  ;;  %v1170_v57 = vadd.f32 %v977_v53, %v561_v49  ;;  %v1202_v58 = vadd.f32 %v1105_v54, %v593_v50 }
 0x1e8   : > { %v2317_v59 = vpop.f32.mrf.mxu0  ;;  %v2349_v60 = vpop.f32.mrf.mxu1 }
 0x1e9   : > { %1234 = vst [vmem:[#allocation2 + $0x1a8] sm:$0xff] %v1170_v57  ;;  %1266 = vst [vmem:[#allocation2 + $0x178] sm:$0xff] %v1202_v58  ;;  %v1175_v63 = vadd.f32 %v2317_v59, %v566_v55  ;;  %v1207_v0 = vadd.f32 %v2349_v60, %v598_v56 }
 0x1ea   : > { %v990_v1 = vpop.f32.mrf.mxu0  ;;  %v1118_v2 = vpop.f32.mrf.mxu1 }
 0x1eb   : > { %1239 = vst [vmem:[#allocation2 + $0x160] sm:$0xff] %v1175_v63  ;;  %1271 = vst [vmem:[#allocation2 + $0xc0] sm:$0xff] %v1207_v0  ;;  %v1173_v5 = vadd.f32 %v990_v1, %v564_v61  ;;  %v1205_v6 = vadd.f32 %v1118_v2, %v596_v62 }
 0x1ec   : > { %v2318_v7 = vpop.f32.mrf.mxu0  ;;  %v2350_v8 = vpop.f32.mrf.mxu1 }
 0x1ed   : > { %1237 = vst [vmem:[#allocation2 + $0x1e8] sm:$0xff] %v1173_v5  ;;  %1269 = vst [vmem:[#allocation2 + $0x198] sm:$0xff] %v1205_v6  ;;  %v1176_v11 = vadd.f32 %v2318_v7, %v567_v3  ;;  %v1208_v12 = vadd.f32 %v2350_v8, %v599_v4 }
 0x1ee   : > { %v993_v13 = vpop.f32.mrf.mxu0  ;;  %v1121_v14 = vpop.f32.mrf.mxu1 }
 0x1ef   : > { %1240 = vst [vmem:[#allocation2 + $0x30] sm:$0xff] %v1176_v11  ;;  %1272 = vst [vmem:[#allocation2 + $0x1c0] sm:$0xff] %v1208_v12  ;;  %v1174_v17 = vadd.f32 %v993_v13, %v565_v9  ;;  %v1206_v18 = vadd.f32 %v1121_v14, %v597_v10 }
 0x1f0   : > { %v2321_v19 = vpop.f32.mrf.mxu0  ;;  %v2353_v20 = vpop.f32.mrf.mxu1 }
 0x1f1   : > { %1238 = vst [vmem:[#allocation2 + $0xf8] sm:$0xff] %v1174_v17  ;;  %1270 = vst [vmem:[#allocation2 + $0x38] sm:$0xff] %v1206_v18  ;;  %v1179_v23 = vadd.f32 %v2321_v19, %v570_v15  ;;  %v1211_v24 = vadd.f32 %v2353_v20, %v602_v16 }
 0x1f2   : > { %v1006_v25 = vpop.f32.mrf.mxu0  ;;  %v1134_v26 = vpop.f32.mrf.mxu1 }
 0x1f3   : > { %1243 = vst [vmem:[#allocation2 + $0xf0] sm:$0xff] %v1179_v23  ;;  %1275 = vst [vmem:[#allocation2 + $0x58] sm:$0xff] %v1211_v24  ;;  %v1177_v29 = vadd.f32 %v1006_v25, %v568_v21  ;;  %v1209_v30 = vadd.f32 %v1134_v26, %v600_v22 }
 0x1f4   : > { %v2322_v31 = vpop.f32.mrf.mxu0  ;;  %v2354_v32 = vpop.f32.mrf.mxu1 }
 0x1f5   : > { %1241 = vst [vmem:[#allocation2 + $0x1e0] sm:$0xff] %v1177_v29  ;;  %1273 = vst [vmem:[#allocation2 + $0x158] sm:$0xff] %v1209_v30  ;;  %v1180_v35 = vadd.f32 %v2322_v31, %v571_v27  ;;  %v1212_v36 = vadd.f32 %v2354_v32, %v603_v28  ;;  %1280 = sbr.rel (%p2060_p13) target bundleno = 593 (0x251), region = 60 }
 0x1f6   : > { %v1009_v37 = vpop.f32.mrf.mxu0  ;;  %v1137_v38 = vpop.f32.mrf.mxu1 }
 0x1f7   : > { %1244 = vst [vmem:[#allocation2 + $0x8] sm:$0xff] %v1180_v35  ;;  %1276 = vst [vmem:[#allocation2 + $0xa0] sm:$0xff] %v1212_v36  ;;  %v1178_v39 = vadd.f32 %v1009_v37, %v569_v33  ;;  %v1210_v40 = vadd.f32 %v1137_v38, %v601_v34 }
 0x1f9   : > { %1242 = vst [vmem:[#allocation2] sm:$0xff] %v1178_v39  ;;  %1274 = vst [vmem:[#allocation2 + $0x10] sm:$0xff] %v1210_v40 }
 0x1fa   : > { %v1281_v41 = vld [vmem:[#allocation2 + $0xb0] sm:$0xff]  ;;  %v3204_v42 = vld [vmem:[%s3587_s18] ss:$0 sm:$0xff]  ;;  %v1283_v47 = vld [vmem:[#allocation2 + $0xd8] sm:$0xff] }
 0x1fb   : > { %v3209_v43 = vld [vmem:[%s3588_s3] ss:$0 sm:$0xff]  ;;  %v1352_v44 = vmul.f32 %v3204_v42, %v1281_v41  ;;  %v1282_v46 = vld [vmem:[#allocation2 + $0x1b0] sm:$0xff]  ;;  %v1354_v51 = vmul.f32 %v3204_v42, %v1283_v47  ;;  %v2204_v52 = vld [vmem:[%s3086_s12 + $0x8] sm:$0xff]  }
 0x1fc   : > { %v2077_v45 = vld [vmem:[%s3086_s12] sm:$0xff]   ;;  %v1353_v49 = vmul.f32 %v3204_v42, %v1282_v46  ;;  %v1284_v53 = vld [vmem:[#allocation2 + $0x18] sm:$0xff]  ;;  %v1285_v54 = vld [vmem:[#allocation2 + $0x50] sm:$0xff]  ;;  %v2082_v56 = vunpack.c.l.bf16 %v2204_v52  ;;  %v2083_v58 = vunpack.c.h.bf16 %v2204_v52 }
 0x1fd   : > { %v2078_v48 = vunpack.c.l.bf16 %v2077_v45  ;;  %v2079_v50 = vunpack.c.h.bf16 %v2077_v45  ;;  %v1423_v55 = vadd.f32 %v3209_v43, %v1352_v44  ;;  %v1355_v57 = vmul.f32 %v3204_v42, %v1284_v53  ;;  %v2205_v59 = vld [vmem:[%s3086_s12 + $0x10] sm:$0xff]   ;;  %v1286_v60 = vld [vmem:[#allocation2 + $0x168] sm:$0xff]  ;;  %v2206_v2 = vld [vmem:[%s3086_s12 + $0x18] sm:$0xff]  }
 0x1fe   : > { %v1287_v61 = vld [vmem:[#allocation2 + $0x130] sm:$0xff]  ;;  %v1424_v62 = vadd.f32 %v3209_v43, %v1353_v49  ;;  %v1425_v63 = vadd.f32 %v3209_v43, %v1354_v51  ;;  %v1356_v0 = vmul.f32 %v3204_v42, %v1285_v54  ;;  %v2086_v1 = vunpack.c.l.bf16 %v2205_v59  ;;  %v1288_v11 = vld [vmem:[#allocation2 + $0x48] sm:$0xff]  ;;  %v1289_v16 = vld [vmem:[#allocation2 + $0x180] sm:$0xff] }
 0x1ff   : > { %v1615_v3 = vadd.f32 %v2078_v48, %v1423_v55  ;;  %v1426_v4 = vadd.f32 %v3209_v43, %v1355_v57  ;;  %v1357_v5 = vmul.f32 %v3204_v42, %v1286_v60  ;;  %v2087_v6 = vunpack.c.h.bf16 %v2205_v59  ;;  %v2207_v17 = vld [vmem:[%s3086_s12 + $0x20] sm:$0xff]   ;;  %v1290_v22 = vld [vmem:[#allocation2 + $0x110] sm:$0xff]  ;;  %v1291_v27 = vld [vmem:[#allocation2 + $0x118] sm:$0xff] }
 0x200   : > { %v1616_v7 = vadd.f32 %v2079_v50, %v1424_v62  ;;  %v1617_v8 = vadd.f32 %v2082_v56, %v1425_v63  ;;  %v1427_v9 = vadd.f32 %v3209_v43, %v1356_v0  ;;  %v1358_v10 = vmul.f32 %v3204_v42, %v1287_v61  ;;  %v2208_v28 = vld [vmem:[%s3086_s12 + $0x28] sm:$0xff]   ;;  %v1292_v33 = vld [vmem:[#allocation2 + $0x98] sm:$0xff]  ;;  %v1293_v38 = vld [vmem:[#allocation2 + $0x120] sm:$0xff] }
 0x201   : > { %v1679_v12 = vmax.f32 %v1615_v3, 0.0  ;;  %v1618_v13 = vadd.f32 %v2083_v58, %v1426_v4  ;;  %v1428_v14 = vadd.f32 %v3209_v43, %v1357_v5  ;;  %v2090_v15 = vunpack.c.l.bf16 %v2206_v2  ;;  %v2209_v39 = vld [vmem:[%s3086_s12 + $0x30] sm:$0xff]   ;;  %v1295_v55 = vld [vmem:[#allocation2 + $0x108] sm:$0xff]  ;;  %v2210_v60 = vld [vmem:[%s3086_s12 + $0x38] sm:$0xff]  }
 0x202   : > { %v1680_v18 = vmax.f32 %v1616_v7, 0.0  ;;  %v1681_v19 = vmax.f32 %v1617_v8, 0.0  ;;  %v1619_v20 = vadd.f32 %v2086_v1, %v1427_v9  ;;  %v1429_v21 = vadd.f32 %v3209_v43, %v1358_v10  ;;  %v1294_v46 = vld [vmem:[#allocation2 + $0x150] sm:$0xff]  ;;  %v1296_v61 = vld [vmem:[#allocation2 + $0x60] sm:$0xff] }
 0x203   : > { %1743 = vst [vmem:[%s3093_s15] sm:$0xff] %v1679_v12  ;;  %v1682_v23 = vmax.f32 %v1618_v13, 0.0  ;;  %v1620_v24 = vadd.f32 %v2087_v6, %v1428_v14  ;;  %v1359_v25 = vmul.f32 %v3204_v42, %v1288_v11  ;;  %v2091_v26 = vunpack.c.h.bf16 %v2206_v2  ;;  %v1297_v6 = vld [vmem:[#allocation2 + $0xe0] sm:$0xff]  ;;  %v1298_v12 = vld [vmem:[#allocation2 + $0x188] sm:$0xff] }
 0x204   : > { %1744 = vst [vmem:[%s3093_s15 + $0x8] sm:$0xff] %v1680_v18  ;;  %1745 = vst [vmem:[%s3093_s15 + $0x10] sm:$0xff] %v1681_v19  ;;  %v1683_v29 = vmax.f32 %v1619_v20, 0.0  ;;  %v1621_v30 = vadd.f32 %v2090_v15, %v1429_v21  ;;  %v1360_v31 = vmul.f32 %v3204_v42, %v1289_v16  ;;  %v2094_v32 = vunpack.c.l.bf16 %v2207_v17  ;;  %v2211_v7 = vld [vmem:[%s3086_s12 + $0x40] sm:$0xff]   ;;  %v2212_v18 = vld [vmem:[%s3086_s12 + $0x48] sm:$0xff]  }
 0x205   : > { %1746 = vst [vmem:[%s3093_s15 + $0x18] sm:$0xff] %v1682_v23  ;;  %v1684_v34 = vmax.f32 %v1620_v24, 0.0  ;;  %v1430_v35 = vadd.f32 %v3209_v43, %v1359_v25  ;;  %v1361_v36 = vmul.f32 %v3204_v42, %v1290_v22  ;;  %v2095_v37 = vunpack.c.h.bf16 %v2207_v17  ;;  %v1299_v17 = vld [vmem:[#allocation2 + $0x138] sm:$0xff]  ;;  %v1300_v23 = vld [vmem:[#allocation2 + $0x140] sm:$0xff] }
 0x206   : > { %1747 = vst [vmem:[%s3093_s15 + $0x20] sm:$0xff] %v1683_v29  ;;  %v1685_v40 = vmax.f32 %v1621_v30, 0.0  ;;  %v1431_v41 = vadd.f32 %v3209_v43, %v1360_v31  ;;  %v1362_v44 = vmul.f32 %v3204_v42, %v1291_v27  ;;  %v2098_v45 = vunpack.c.l.bf16 %v2208_v28 }
 0x207   : > { %1748 = vst [vmem:[%s3093_s15 + $0x28] sm:$0xff] %v1684_v34  ;;  %v1622_v47 = vadd.f32 %v2091_v26, %v1430_v35  ;;  %v1432_v48 = vadd.f32 %v3209_v43, %v1361_v36  ;;  %v1363_v49 = vmul.f32 %v3204_v42, %v1292_v33  ;;  %v2099_v50 = vunpack.c.h.bf16 %v2208_v28  ;;  %v1301_v28 = vld [vmem:[#allocation2 + $0x80] sm:$0xff]  ;;  %v2213_v33 = vld [vmem:[%s3086_s12 + $0x50] sm:$0xff]   ;;  %v1302_v34 = vld [vmem:[#allocation2 + $0x1a8] sm:$0xff] }
 0x208   : > { %1749 = vst [vmem:[%s3093_s15 + $0x30] sm:$0xff] %v1685_v40  ;;  %v1623_v51 = vadd.f32 %v2094_v32, %v1431_v41  ;;  %v1433_v52 = vadd.f32 %v3209_v43, %v1362_v44  ;;  %v1364_v53 = vmul.f32 %v3204_v42, %v1293_v38  ;;  %v2102_v54 = vunpack.c.l.bf16 %v2209_v39 }
 0x209   : > { %v1686_v56 = vmax.f32 %v1622_v47, 0.0  ;;  %v1624_v57 = vadd.f32 %v2095_v37, %v1432_v48  ;;  %v1434_v58 = vadd.f32 %v3209_v43, %v1363_v49  ;;  %v1365_v59 = vmul.f32 %v3204_v42, %v1294_v46 }
 0x20a   : > { %v1687_v62 = vmax.f32 %v1623_v51, 0.0  ;;  %v1625_v63 = vadd.f32 %v2098_v45, %v1433_v52  ;;  %v1435_v0 = vadd.f32 %v3209_v43, %v1364_v53  ;;  %v2103_v1 = vunpack.c.h.bf16 %v2209_v39  ;;  %v1303_v45 = vld [vmem:[#allocation2 + $0x1b8] sm:$0xff]  ;;  %v1304_v51 = vld [vmem:[#allocation2 + $0x28] sm:$0xff] }
 0x20b   : > { %1750 = vst [vmem:[%s3093_s15 + $0x38] sm:$0xff] %v1686_v56  ;;  %v1688_v2 = vmax.f32 %v1624_v57, 0.0  ;;  %v1626_v3 = vadd.f32 %v2099_v50, %v1434_v58  ;;  %v1436_v4 = vadd.f32 %v3209_v43, %v1365_v59  ;;  %v1366_v5 = vmul.f32 %v3204_v42, %v1295_v55  ;;  %v2214_v50 = vld [vmem:[%s3086_s12 + $0x58] sm:$0xff]  }
 0x20c   : > { %1751 = vst [vmem:[%s3093_s15 + $0x40] sm:$0xff] %v1687_v62  ;;  %v1689_v8 = vmax.f32 %v1625_v63, 0.0  ;;  %v1627_v9 = vadd.f32 %v2102_v54, %v1435_v0  ;;  %v2106_v10 = vunpack.c.l.bf16 %v2210_v60  ;;  %v1367_v11 = vmul.f32 %v3204_v42, %v1296_v61  ;;  %v2215_v61 = vld [vmem:[%s3086_s12 + $0x60] sm:$0xff]  }
 0x20d   : > { %1752 = vst [vmem:[%s3093_s15 + $0x48] sm:$0xff] %v1688_v2  ;;  %v1690_v13 = vmax.f32 %v1626_v3, 0.0  ;;  %v1628_v14 = vadd.f32 %v2103_v1, %v1436_v4  ;;  %v1437_v15 = vadd.f32 %v3209_v43, %v1366_v5  ;;  %v2107_v16 = vunpack.c.h.bf16 %v2210_v60  ;;  %v1305_v60 = vld [vmem:[#allocation2 + $0x1e8] sm:$0xff]  ;;  %v1306_v2 = vld [vmem:[#allocation2 + $0xf8] sm:$0xff] }
 0x20e   : > { %1753 = vst [vmem:[%s3093_s15 + $0x50] sm:$0xff] %v1689_v8  ;;  %v1691_v19 = vmax.f32 %v1627_v9, 0.0  ;;  %v1438_v20 = vadd.f32 %v3209_v43, %v1367_v11  ;;  %v1368_v21 = vmul.f32 %v3204_v42, %v1297_v6  ;;  %v2110_v22 = vunpack.c.l.bf16 %v2211_v7  ;;  %v2216_v8 = vld [vmem:[%s3086_s12 + $0x68] sm:$0xff]  }
 0x20f   : > { %1754 = vst [vmem:[%s3093_s15 + $0x58] sm:$0xff] %v1690_v13  ;;  %v1692_v24 = vmax.f32 %v1628_v14, 0.0  ;;  %v1629_v25 = vadd.f32 %v2106_v10, %v1437_v15  ;;  %v1369_v26 = vmul.f32 %v3204_v42, %v1298_v12  ;;  %v2111_v27 = vunpack.c.h.bf16 %v2211_v7  ;;  %v1307_v7 = vld [vmem:[#allocation2 + $0x160] sm:$0xff]  ;;  %v1308_v13 = vld [vmem:[#allocation2 + $0x30] sm:$0xff] }
 0x210   : > { %1755 = vst [vmem:[%s3093_s15 + $0x60] sm:$0xff] %v1691_v19  ;;  %v1630_v29 = vadd.f32 %v2107_v16, %v1438_v20  ;;  %v1439_v30 = vadd.f32 %v3209_v43, %v1368_v21  ;;  %v1370_v31 = vmul.f32 %v3204_v42, %v1299_v17  ;;  %v2114_v32 = vunpack.c.l.bf16 %v2212_v18 }
 0x211   : > { %1756 = vst [vmem:[%s3093_s15 + $0x68] sm:$0xff] %v1692_v24  ;;  %v1693_v35 = vmax.f32 %v1629_v25, 0.0  ;;  %v1440_v36 = vadd.f32 %v3209_v43, %v1369_v26  ;;  %v1371_v37 = vmul.f32 %v3204_v42, %v1300_v23  ;;  %v2115_v38 = vunpack.c.h.bf16 %v2212_v18  ;;  %v1309_v18 = vld [vmem:[#allocation2 + $0x1e0] sm:$0xff]  ;;  %v2217_v23 = vld [vmem:[%s3086_s12 + $0x70] sm:$0xff]  }
 0x212   : > { %v1694_v39 = vmax.f32 %v1630_v29, 0.0  ;;  %v1631_v40 = vadd.f32 %v2110_v22, %v1439_v30  ;;  %v1441_v41 = vadd.f32 %v3209_v43, %v1370_v31  ;;  %v1372_v44 = vmul.f32 %v3204_v42, %v1301_v28  ;;  %v1310_v24 = vld [vmem:[#allocation2] sm:$0xff] }
 0x213   : > { %1757 = vst [vmem:[%s3093_s15 + $0x70] sm:$0xff] %v1693_v35  ;;  %v1632_v46 = vadd.f32 %v2111_v27, %v1440_v36  ;;  %v1442_v47 = vadd.f32 %v3209_v43, %v1371_v37  ;;  %v2118_v48 = vunpack.c.l.bf16 %v2213_v33  ;;  %v1373_v49 = vmul.f32 %v3204_v42, %v1302_v34 }
 0x214   : > { %1758 = vst [vmem:[%s3093_s15 + $0x78] sm:$0xff] %v1694_v39  ;;  %v1695_v52 = vmax.f32 %v1631_v40, 0.0  ;;  %v1633_v53 = vadd.f32 %v2114_v32, %v1441_v41  ;;  %v1443_v54 = vadd.f32 %v3209_v43, %v1372_v44  ;;  %v2119_v55 = vunpack.c.h.bf16 %v2213_v33  ;;  %v1311_v33 = vld [vmem:[#allocation2 + $0xf0] sm:$0xff]  ;;  %v1312_v39 = vld [vmem:[#allocation2 + $0x8] sm:$0xff] }
 0x215   : > { %v1696_v56 = vmax.f32 %v1632_v46, 0.0  ;;  %v1634_v57 = vadd.f32 %v2115_v38, %v1442_v47  ;;  %v1444_v58 = vadd.f32 %v3209_v43, %v1373_v49  ;;  %v1374_v59 = vmul.f32 %v3204_v42, %v1303_v45  ;;  %v2218_v38 = vld [vmem:[%s3086_s12 + $0x78] sm:$0xff]  }
 0x216   : > { %1759 = vst [vmem:[%s3093_s15 + $0x80] sm:$0xff] %v1695_v52  ;;  %v1697_v62 = vmax.f32 %v1633_v53, 0.0  ;;  %v1635_v63 = vadd.f32 %v2118_v48, %v1443_v54  ;;  %v2122_v0 = vunpack.c.l.bf16 %v2214_v50  ;;  %v1375_v1 = vmul.f32 %v3204_v42, %v1304_v51  ;;  %v2219_v51 = vld [vmem:[%s3086_s12 + $0x80] sm:$0xff]  }
 0x217   : > { %1760 = vst [vmem:[%s3093_s15 + $0x88] sm:$0xff] %v1696_v56  ;;  %v1698_v3 = vmax.f32 %v1634_v57, 0.0  ;;  %v1636_v4 = vadd.f32 %v2119_v55, %v1444_v58  ;;  %v1445_v5 = vadd.f32 %v3209_v43, %v1374_v59  ;;  %v2123_v6 = vunpack.c.h.bf16 %v2214_v50  ;;  %v1313_v50 = vld [vmem:[#allocation2 + $0x148] sm:$0xff]  ;;  %v1314_v56 = vld [vmem:[#allocation2 + $0x1d0] sm:$0xff] }
 0x218   : > { %1761 = vst [vmem:[%s3093_s15 + $0x90] sm:$0xff] %v1697_v62  ;;  %v1699_v9 = vmax.f32 %v1635_v63, 0.0  ;;  %v1446_v10 = vadd.f32 %v3209_v43, %v1375_v1  ;;  %v1376_v11 = vmul.f32 %v3204_v42, %v1305_v60  ;;  %v2126_v12 = vunpack.c.l.bf16 %v2215_v61  ;;  %v2220_v62 = vld [vmem:[%s3086_s12 + $0x88] sm:$0xff]  }
 0x219   : > { %1762 = vst [vmem:[%s3093_s15 + $0x98] sm:$0xff] %v1698_v3  ;;  %v1700_v14 = vmax.f32 %v1636_v4, 0.0  ;;  %v1637_v15 = vadd.f32 %v2122_v0, %v1445_v5  ;;  %v1377_v16 = vmul.f32 %v3204_v42, %v1306_v2  ;;  %v2127_v17 = vunpack.c.h.bf16 %v2215_v61  ;;  %v1315_v61 = vld [vmem:[#allocation2 + $0x100] sm:$0xff]  ;;  %v1316_v3 = vld [vmem:[#allocation2 + $0xc8] sm:$0xff] }
 0x21a   : > { %1763 = vst [vmem:[%s3093_s15 + $0xa0] sm:$0xff] %v1699_v9  ;;  %v1638_v19 = vadd.f32 %v2123_v6, %v1446_v10  ;;  %v1447_v20 = vadd.f32 %v3209_v43, %v1376_v11  ;;  %v1378_v21 = vmul.f32 %v3204_v42, %v1307_v7  ;;  %v2130_v22 = vunpack.c.l.bf16 %v2216_v8 }
 0x21b   : > { %1764 = vst [vmem:[%s3093_s15 + $0xa8] sm:$0xff] %v1700_v14  ;;  %v1701_v25 = vmax.f32 %v1637_v15, 0.0  ;;  %v1448_v26 = vadd.f32 %v3209_v43, %v1377_v16  ;;  %v1379_v27 = vmul.f32 %v3204_v42, %v1308_v13  ;;  %v2131_v28 = vunpack.c.h.bf16 %v2216_v8  ;;  %v1317_v8 = vld [vmem:[#allocation2 + $0x40] sm:$0xff]  ;;  %v2221_v13 = vld [vmem:[%s3086_s12 + $0x90] sm:$0xff]   ;;  %v1318_v14 = vld [vmem:[#allocation2 + $0x1f8] sm:$0xff] }
 0x21c   : > { %v1702_v29 = vmax.f32 %v1638_v19, 0.0  ;;  %v1639_v30 = vadd.f32 %v2126_v12, %v1447_v20  ;;  %v1449_v31 = vadd.f32 %v3209_v43, %v1378_v21  ;;  %v1380_v32 = vmul.f32 %v3204_v42, %v1309_v18 }
 0x21d   : > { %1765 = vst [vmem:[%s3093_s15 + $0xb0] sm:$0xff] %v1701_v25  ;;  %v1640_v34 = vadd.f32 %v2127_v17, %v1448_v26  ;;  %v1450_v35 = vadd.f32 %v3209_v43, %v1379_v27  ;;  %v2134_v36 = vunpack.c.l.bf16 %v2217_v23  ;;  %v1381_v37 = vmul.f32 %v3204_v42, %v1310_v24 }
 0x21e   : > { %1766 = vst [vmem:[%s3093_s15 + $0xb8] sm:$0xff] %v1702_v29  ;;  %v1703_v40 = vmax.f32 %v1639_v30, 0.0  ;;  %v1641_v41 = vadd.f32 %v2130_v22, %v1449_v31  ;;  %v1451_v44 = vadd.f32 %v3209_v43, %v1380_v32  ;;  %v2135_v45 = vunpack.c.h.bf16 %v2217_v23  ;;  %v1319_v23 = vld [vmem:[#allocation2 + $0x20] sm:$0xff]  ;;  %v1320_v29 = vld [vmem:[#allocation2 + $0x128] sm:$0xff] }
 0x21f   : > { %v1704_v46 = vmax.f32 %v1640_v34, 0.0  ;;  %v1642_v47 = vadd.f32 %v2131_v28, %v1450_v35  ;;  %v1452_v48 = vadd.f32 %v3209_v43, %v1381_v37  ;;  %v1382_v49 = vmul.f32 %v3204_v42, %v1311_v33  ;;  %v2222_v28 = vld [vmem:[%s3086_s12 + $0x98] sm:$0xff]  }
 0x220   : > { %1767 = vst [vmem:[%s3093_s15 + $0xc0] sm:$0xff] %v1703_v40  ;;  %v1705_v52 = vmax.f32 %v1641_v41, 0.0  ;;  %v1643_v53 = vadd.f32 %v2134_v36, %v1451_v44  ;;  %v2138_v54 = vunpack.c.l.bf16 %v2218_v38  ;;  %v1383_v55 = vmul.f32 %v3204_v42, %v1312_v39  ;;  %v2223_v39 = vld [vmem:[%s3086_s12 + $0xa0] sm:$0xff]  }
 0x221   : > { %1768 = vst [vmem:[%s3093_s15 + $0xc8] sm:$0xff] %v1704_v46  ;;  %v1706_v57 = vmax.f32 %v1642_v47, 0.0  ;;  %v1644_v58 = vadd.f32 %v2135_v45, %v1452_v48  ;;  %v1453_v59 = vadd.f32 %v3209_v43, %v1382_v49  ;;  %v2139_v60 = vunpack.c.h.bf16 %v2218_v38  ;;  %v1321_v38 = vld [vmem:[#allocation2 + $0x1a0] sm:$0xff]  ;;  %v1322_v46 = vld [vmem:[#allocation2 + $0x1f0] sm:$0xff] }
 0x222   : > { %1769 = vst [vmem:[%s3093_s15 + $0xd0] sm:$0xff] %v1705_v52  ;;  %v1707_v63 = vmax.f32 %v1643_v53, 0.0  ;;  %v1454_v0 = vadd.f32 %v3209_v43, %v1383_v55  ;;  %v1384_v1 = vmul.f32 %v3204_v42, %v1313_v50  ;;  %v2142_v2 = vunpack.c.l.bf16 %v2219_v51  ;;  %v2224_v52 = vld [vmem:[%s3086_s12 + $0xa8] sm:$0xff]  }
 0x223   : > { %1770 = vst [vmem:[%s3093_s15 + $0xd8] sm:$0xff] %v1706_v57  ;;  %v1708_v4 = vmax.f32 %v1644_v58, 0.0  ;;  %v1645_v5 = vadd.f32 %v2138_v54, %v1453_v59  ;;  %v1385_v6 = vmul.f32 %v3204_v42, %v1314_v56  ;;  %v2143_v7 = vunpack.c.h.bf16 %v2219_v51  ;;  %v1323_v51 = vld [vmem:[#allocation2 + $0xe8] sm:$0xff]  ;;  %v1324_v57 = vld [vmem:[#allocation2 + $0x78] sm:$0xff] }
 0x224   : > { %1771 = vst [vmem:[%s3093_s15 + $0xe0] sm:$0xff] %v1707_v63  ;;  %v1646_v9 = vadd.f32 %v2139_v60, %v1454_v0  ;;  %v1455_v10 = vadd.f32 %v3209_v43, %v1384_v1  ;;  %v1386_v11 = vmul.f32 %v3204_v42, %v1315_v61  ;;  %v2146_v12 = vunpack.c.l.bf16 %v2220_v62 }
 0x225   : > { %1772 = vst [vmem:[%s3093_s15 + $0xe8] sm:$0xff] %v1708_v4  ;;  %v1709_v15 = vmax.f32 %v1645_v5, 0.0  ;;  %v1456_v16 = vadd.f32 %v3209_v43, %v1385_v6  ;;  %v1387_v17 = vmul.f32 %v3204_v42, %v1316_v3  ;;  %v2147_v18 = vunpack.c.h.bf16 %v2220_v62  ;;  %v1325_v62 = vld [vmem:[#allocation2 + $0x70] sm:$0xff] }
 0x226   : > { %v1710_v19 = vmax.f32 %v1646_v9, 0.0  ;;  %v1647_v20 = vadd.f32 %v2142_v2, %v1455_v10  ;;  %v1457_v21 = vadd.f32 %v3209_v43, %v1386_v11  ;;  %v1388_v22 = vmul.f32 %v3204_v42, %v1317_v8  ;;  %v2225_v3 = vld [vmem:[%s3086_s12 + $0xb0] sm:$0xff]  }
 0x227   : > { %1773 = vst [vmem:[%s3093_s15 + $0xf0] sm:$0xff] %v1709_v15  ;;  %v1648_v24 = vadd.f32 %v2143_v7, %v1456_v16  ;;  %v1458_v25 = vadd.f32 %v3209_v43, %v1387_v17  ;;  %v2150_v26 = vunpack.c.l.bf16 %v2221_v13  ;;  %v1389_v27 = vmul.f32 %v3204_v42, %v1318_v14  ;;  %v1326_v4 = vld [vmem:[#allocation2 + $0x90] sm:$0xff] }
 0x228   : > { %1774 = vst [vmem:[%s3093_s15 + $0xf8] sm:$0xff] %v1710_v19  ;;  %v1711_v30 = vmax.f32 %v1647_v20, 0.0  ;;  %v1649_v31 = vadd.f32 %v2146_v12, %v1457_v21  ;;  %v1459_v32 = vadd.f32 %v3209_v43, %v1388_v22  ;;  %v2151_v33 = vunpack.c.h.bf16 %v2221_v13  ;;  %v1327_v13 = vld [vmem:[#allocation2 + $0x1d8] sm:$0xff]  ;;  %v1328_v19 = vld [vmem:[#allocation2 + $0xd0] sm:$0xff] }
 0x229   : > { %v1712_v34 = vmax.f32 %v1648_v24, 0.0  ;;  %v1650_v35 = vadd.f32 %v2147_v18, %v1458_v25  ;;  %v1460_v36 = vadd.f32 %v3209_v43, %v1389_v27  ;;  %v1390_v37 = vmul.f32 %v3204_v42, %v1319_v23  ;;  %v2226_v18 = vld [vmem:[%s3086_s12 + $0xb8] sm:$0xff]  }
 0x22a   : > { %1775 = vst [vmem:[%s3093_s15 + $0x100] sm:$0xff] %v1711_v30  ;;  %v1713_v40 = vmax.f32 %v1649_v31, 0.0  ;;  %v1651_v41 = vadd.f32 %v2150_v26, %v1459_v32  ;;  %v2154_v44 = vunpack.c.l.bf16 %v2222_v28  ;;  %v1391_v45 = vmul.f32 %v3204_v42, %v1320_v29  ;;  %v2227_v29 = vld [vmem:[%s3086_s12 + $0xc0] sm:$0xff]  }
 0x22b   : > { %1776 = vst [vmem:[%s3093_s15 + $0x108] sm:$0xff] %v1712_v34  ;;  %v1714_v47 = vmax.f32 %v1650_v35, 0.0  ;;  %v1652_v48 = vadd.f32 %v2151_v33, %v1460_v36  ;;  %v1461_v49 = vadd.f32 %v3209_v43, %v1390_v37  ;;  %v2155_v50 = vunpack.c.h.bf16 %v2222_v28  ;;  %v1329_v28 = vld [vmem:[#allocation2 + $0xb8] sm:$0xff]  ;;  %v1330_v34 = vld [vmem:[#allocation2 + $0x88] sm:$0xff] }
 0x22c   : > { %1777 = vst [vmem:[%s3093_s15 + $0x110] sm:$0xff] %v1713_v40  ;;  %v1715_v53 = vmax.f32 %v1651_v41, 0.0  ;;  %v1462_v54 = vadd.f32 %v3209_v43, %v1391_v45  ;;  %v1392_v55 = vmul.f32 %v3204_v42, %v1321_v38  ;;  %v2158_v56 = vunpack.c.l.bf16 %v2223_v39  ;;  %v2228_v40 = vld [vmem:[%s3086_s12 + $0xc8] sm:$0xff]  }
 0x22d   : > { %1778 = vst [vmem:[%s3093_s15 + $0x118] sm:$0xff] %v1714_v47  ;;  %v1716_v58 = vmax.f32 %v1652_v48, 0.0  ;;  %v1653_v59 = vadd.f32 %v2154_v44, %v1461_v49  ;;  %v1393_v60 = vmul.f32 %v3204_v42, %v1322_v46  ;;  %v2159_v61 = vunpack.c.h.bf16 %v2223_v39  ;;  %v1331_v39 = vld [vmem:[#allocation2 + $0xa8] sm:$0xff] }
 0x22e   : > { %1779 = vst [vmem:[%s3093_s15 + $0x120] sm:$0xff] %v1715_v53  ;;  %v1654_v63 = vadd.f32 %v2155_v50, %v1462_v54  ;;  %v1463_v0 = vadd.f32 %v3209_v43, %v1392_v55  ;;  %v1394_v1 = vmul.f32 %v3204_v42, %v1323_v51  ;;  %v2162_v2 = vunpack.c.l.bf16 %v2224_v52  ;;  %v1332_v47 = vld [vmem:[#allocation2 + $0x1c8] sm:$0xff] }
 0x22f   : > { %1780 = vst [vmem:[%s3093_s15 + $0x128] sm:$0xff] %v1716_v58  ;;  %v1717_v5 = vmax.f32 %v1653_v59, 0.0  ;;  %v1464_v6 = vadd.f32 %v3209_v43, %v1393_v60  ;;  %v1395_v7 = vmul.f32 %v3204_v42, %v1324_v57  ;;  %v2163_v8 = vunpack.c.h.bf16 %v2224_v52  ;;  %v1333_v52 = vld [vmem:[#allocation2 + $0x170] sm:$0xff]  ;;  %v1334_v58 = vld [vmem:[#allocation2 + $0x178] sm:$0xff] }
 0x230   : > { %v1718_v9 = vmax.f32 %v1654_v63, 0.0  ;;  %v1655_v10 = vadd.f32 %v2158_v56, %v1463_v0  ;;  %v1465_v11 = vadd.f32 %v3209_v43, %v1394_v1  ;;  %v1396_v12 = vmul.f32 %v3204_v42, %v1325_v62  ;;  %v2229_v57 = vld [vmem:[%s3086_s12 + $0xd0] sm:$0xff]  }
 0x231   : > { %1781 = vst [vmem:[%s3093_s15 + $0x130] sm:$0xff] %v1717_v5  ;;  %v1656_v14 = vadd.f32 %v2159_v61, %v1464_v6  ;;  %v1466_v15 = vadd.f32 %v3209_v43, %v1395_v7  ;;  %v2166_v16 = vunpack.c.l.bf16 %v2225_v3  ;;  %v1397_v17 = vmul.f32 %v3204_v42, %v1326_v4 }
 0x232   : > { %1782 = vst [vmem:[%s3093_s15 + $0x138] sm:$0xff] %v1718_v9  ;;  %v1719_v20 = vmax.f32 %v1655_v10, 0.0  ;;  %v1657_v21 = vadd.f32 %v2162_v2, %v1465_v11  ;;  %v1467_v22 = vadd.f32 %v3209_v43, %v1396_v12  ;;  %v2167_v23 = vunpack.c.h.bf16 %v2225_v3  ;;  %v1335_v3 = vld [vmem:[#allocation2 + $0x68] sm:$0xff]  ;;  %v1336_v9 = vld [vmem:[#allocation2 + $0x190] sm:$0xff] }
 0x233   : > { %v1720_v24 = vmax.f32 %v1656_v14, 0.0  ;;  %v1658_v25 = vadd.f32 %v2163_v8, %v1466_v15  ;;  %v1468_v26 = vadd.f32 %v3209_v43, %v1397_v17  ;;  %v1398_v27 = vmul.f32 %v3204_v42, %v1327_v13  ;;  %v2230_v8 = vld [vmem:[%s3086_s12 + $0xd8] sm:$0xff]  }
 0x234   : > { %1783 = vst [vmem:[%s3093_s15 + $0x140] sm:$0xff] %v1719_v20  ;;  %v1721_v30 = vmax.f32 %v1657_v21, 0.0  ;;  %v1659_v31 = vadd.f32 %v2166_v16, %v1467_v22  ;;  %v2170_v32 = vunpack.c.l.bf16 %v2226_v18  ;;  %v1399_v33 = vmul.f32 %v3204_v42, %v1328_v19  ;;  %v2231_v19 = vld [vmem:[%s3086_s12 + $0xe0] sm:$0xff]  }
 0x235   : > { %1784 = vst [vmem:[%s3093_s15 + $0x148] sm:$0xff] %v1720_v24  ;;  %v1722_v35 = vmax.f32 %v1658_v25, 0.0  ;;  %v1660_v36 = vadd.f32 %v2167_v23, %v1468_v26  ;;  %v1469_v37 = vadd.f32 %v3209_v43, %v1398_v27  ;;  %v2171_v38 = vunpack.c.h.bf16 %v2226_v18  ;;  %v1337_v18 = vld [vmem:[#allocation2 + $0x198] sm:$0xff] }
 0x236   : > { %1785 = vst [vmem:[%s3093_s15 + $0x150] sm:$0xff] %v1721_v30  ;;  %v1723_v41 = vmax.f32 %v1659_v31, 0.0  ;;  %v1470_v44 = vadd.f32 %v3209_v43, %v1399_v33  ;;  %v1400_v45 = vmul.f32 %v3204_v42, %v1329_v28  ;;  %v2174_v46 = vunpack.c.l.bf16 %v2227_v29  ;;  %v1338_v24 = vld [vmem:[#allocation2 + $0x38] sm:$0xff]  ;;  %v2232_v30 = vld [vmem:[%s3086_s12 + $0xe8] sm:$0xff]  }
 0x237   : > { %1786 = vst [vmem:[%s3093_s15 + $0x158] sm:$0xff] %v1722_v35  ;;  %v1724_v48 = vmax.f32 %v1660_v36, 0.0  ;;  %v1661_v49 = vadd.f32 %v2170_v32, %v1469_v37  ;;  %v1401_v50 = vmul.f32 %v3204_v42, %v1330_v34  ;;  %v2175_v51 = vunpack.c.h.bf16 %v2227_v29  ;;  %v1339_v29 = vld [vmem:[#allocation2 + $0xc0] sm:$0xff] }
 0x238   : > { %1787 = vst [vmem:[%s3093_s15 + $0x160] sm:$0xff] %v1723_v41  ;;  %v1662_v53 = vadd.f32 %v2171_v38, %v1470_v44  ;;  %v1471_v54 = vadd.f32 %v3209_v43, %v1400_v45  ;;  %v1402_v55 = vmul.f32 %v3204_v42, %v1331_v39  ;;  %v2178_v56 = vunpack.c.l.bf16 %v2228_v40  ;;  %v1340_v35 = vld [vmem:[#allocation2 + $0x1c0] sm:$0xff] }
 0x239   : > { %1788 = vst [vmem:[%s3093_s15 + $0x168] sm:$0xff] %v1724_v48  ;;  %v1725_v59 = vmax.f32 %v1661_v49, 0.0  ;;  %v1472_v60 = vadd.f32 %v3209_v43, %v1401_v50  ;;  %v1403_v61 = vmul.f32 %v3204_v42, %v1332_v47  ;;  %v2179_v62 = vunpack.c.h.bf16 %v2228_v40  ;;  %v1341_v40 = vld [vmem:[#allocation2 + $0x158] sm:$0xff]  ;;  %v2233_v47 = vld [vmem:[%s3086_s12 + $0xf0] sm:$0xff]  }
 0x23a   : > { %v1726_v63 = vmax.f32 %v1662_v53, 0.0  ;;  %v1663_v0 = vadd.f32 %v2174_v46, %v1471_v54  ;;  %v1473_v1 = vadd.f32 %v3209_v43, %v1402_v55  ;;  %v1404_v2 = vmul.f32 %v3204_v42, %v1333_v52  ;;  %v1342_v48 = vld [vmem:[#allocation2 + $0x10] sm:$0xff] }
 0x23b   : > { %1789 = vst [vmem:[%s3093_s15 + $0x170] sm:$0xff] %v1725_v59  ;;  %v1664_v4 = vadd.f32 %v2175_v51, %v1472_v60  ;;  %v1474_v5 = vadd.f32 %v3209_v43, %v1403_v61  ;;  %v2182_v6 = vunpack.c.l.bf16 %v2229_v57  ;;  %v1405_v7 = vmul.f32 %v3204_v42, %v1334_v58 }
 0x23c   : > { %1790 = vst [vmem:[%s3093_s15 + $0x178] sm:$0xff] %v1726_v63  ;;  %v1727_v10 = vmax.f32 %v1663_v0, 0.0  ;;  %v1665_v11 = vadd.f32 %v2178_v56, %v1473_v1  ;;  %v1475_v12 = vadd.f32 %v3209_v43, %v1404_v2  ;;  %v2183_v13 = vunpack.c.h.bf16 %v2229_v57  ;;  %v1343_v57 = vld [vmem:[#allocation2 + $0x58] sm:$0xff]  ;;  %v1344_v63 = vld [vmem:[#allocation2 + $0xa0] sm:$0xff] }
 0x23d   : > { %v1728_v14 = vmax.f32 %v1664_v4, 0.0  ;;  %v1666_v15 = vadd.f32 %v2179_v62, %v1474_v5  ;;  %v1476_v16 = vadd.f32 %v3209_v43, %v1405_v7  ;;  %v1406_v17 = vmul.f32 %v3204_v42, %v1335_v3  ;;  %v2234_v62 = vld [vmem:[%s3086_s12 + $0xf8] sm:$0xff]  }
 0x23e   : > { %1791 = vst [vmem:[%s3093_s15 + $0x180] sm:$0xff] %v1727_v10  ;;  %v1729_v20 = vmax.f32 %v1665_v11, 0.0  ;;  %v1667_v21 = vadd.f32 %v2182_v6, %v1475_v12  ;;  %v2186_v22 = vunpack.c.l.bf16 %v2230_v8  ;;  %v1407_v23 = vmul.f32 %v3204_v42, %v1336_v9 }
 0x23f   : > { %1792 = vst [vmem:[%s3093_s15 + $0x188] sm:$0xff] %v1728_v14  ;;  %v1730_v25 = vmax.f32 %v1666_v15, 0.0  ;;  %v1668_v26 = vadd.f32 %v2183_v13, %v1476_v16  ;;  %v1477_v27 = vadd.f32 %v3209_v43, %v1406_v17  ;;  %v2187_v28 = vunpack.c.h.bf16 %v2230_v8 }
 0x240   : > { %1793 = vst [vmem:[%s3093_s15 + $0x190] sm:$0xff] %v1729_v20  ;;  %v1731_v31 = vmax.f32 %v1667_v21, 0.0  ;;  %v1478_v32 = vadd.f32 %v3209_v43, %v1407_v23  ;;  %v1408_v33 = vmul.f32 %v3204_v42, %v1337_v18  ;;  %v2190_v34 = vunpack.c.l.bf16 %v2231_v19 }
 0x241   : > { %1794 = vst [vmem:[%s3093_s15 + $0x198] sm:$0xff] %v1730_v25  ;;  %v1732_v36 = vmax.f32 %v1668_v26, 0.0  ;;  %v1669_v37 = vadd.f32 %v2186_v22, %v1477_v27  ;;  %v1409_v38 = vmul.f32 %v3204_v42, %v1338_v24  ;;  %v2191_v39 = vunpack.c.h.bf16 %v2231_v19 }
 0x242   : > { %1795 = vst [vmem:[%s3093_s15 + $0x1a0] sm:$0xff] %v1731_v31  ;;  %v1670_v41 = vadd.f32 %v2187_v28, %v1478_v32  ;;  %v1479_v44 = vadd.f32 %v3209_v43, %v1408_v33  ;;  %v1410_v45 = vmul.f32 %v3204_v42, %v1339_v29  ;;  %v2194_v46 = vunpack.c.l.bf16 %v2232_v30 }
 0x243   : > { %1796 = vst [vmem:[%s3093_s15 + $0x1a8] sm:$0xff] %v1732_v36  ;;  %v1733_v49 = vmax.f32 %v1669_v37, 0.0  ;;  %v1480_v50 = vadd.f32 %v3209_v43, %v1409_v38  ;;  %v1411_v51 = vmul.f32 %v3204_v42, %v1340_v35  ;;  %v2195_v52 = vunpack.c.h.bf16 %v2232_v30 }
 0x244   : > { %v1734_v53 = vmax.f32 %v1670_v41, 0.0  ;;  %v1671_v54 = vadd.f32 %v2190_v34, %v1479_v44  ;;  %v1481_v55 = vadd.f32 %v3209_v43, %v1410_v45  ;;  %v1412_v56 = vmul.f32 %v3204_v42, %v1341_v40 }
 0x245   : > { %1797 = vst [vmem:[%s3093_s15 + $0x1b0] sm:$0xff] %v1733_v49  ;;  %v1672_v58 = vadd.f32 %v2191_v39, %v1480_v50  ;;  %v1482_v59 = vadd.f32 %v3209_v43, %v1411_v51  ;;  %v2198_v60 = vunpack.c.l.bf16 %v2233_v47  ;;  %v1413_v61 = vmul.f32 %v3204_v42, %v1342_v48 }
 0x246   : > { %1798 = vst [vmem:[%s3093_s15 + $0x1b8] sm:$0xff] %v1734_v53  ;;  %v1735_v0 = vmax.f32 %v1671_v54, 0.0  ;;  %v1673_v1 = vadd.f32 %v2194_v46, %v1481_v55  ;;  %v1483_v2 = vadd.f32 %v3209_v43, %v1412_v56  ;;  %v2199_v3 = vunpack.c.h.bf16 %v2233_v47 }
 0x247   : > { %v1736_v4 = vmax.f32 %v1672_v58, 0.0  ;;  %v1674_v5 = vadd.f32 %v2195_v52, %v1482_v59  ;;  %v1484_v6 = vadd.f32 %v3209_v43, %v1413_v61  ;;  %v1414_v7 = vmul.f32 %v3204_v42, %v1343_v57 }
 0x248   : > { %1799 = vst [vmem:[%s3093_s15 + $0x1c0] sm:$0xff] %v1735_v0  ;;  %v1737_v8 = vmax.f32 %v1673_v1, 0.0  ;;  %v1675_v9 = vadd.f32 %v2198_v60, %v1483_v2  ;;  %v2202_v10 = vunpack.c.l.bf16 %v2234_v62  ;;  %v1415_v11 = vmul.f32 %v3204_v42, %v1344_v63 }
 0x249   : > { %1800 = vst [vmem:[%s3093_s15 + $0x1c8] sm:$0xff] %v1736_v4  ;;  %v1738_v12 = vmax.f32 %v1674_v5, 0.0  ;;  %v1676_v13 = vadd.f32 %v2199_v3, %v1484_v6  ;;  %v1485_v14 = vadd.f32 %v3209_v43, %v1414_v7  ;;  %v2203_v15 = vunpack.c.h.bf16 %v2234_v62 }
 0x24a   : > { %1801 = vst [vmem:[%s3093_s15 + $0x1d0] sm:$0xff] %v1737_v8  ;;  %v1739_v16 = vmax.f32 %v1675_v9, 0.0  ;;  %v1486_v17 = vadd.f32 %v3209_v43, %v1415_v11 }
 0x24b   : > { %1802 = vst [vmem:[%s3093_s15 + $0x1d8] sm:$0xff] %v1738_v12  ;;  %v1740_v18 = vmax.f32 %v1676_v13, 0.0  ;;  %v1677_v19 = vadd.f32 %v2202_v10, %v1485_v14 }
 0x24c   : > { %1803 = vst [vmem:[%s3093_s15 + $0x1e0] sm:$0xff] %v1739_v16  ;;  %v1678_v20 = vadd.f32 %v2203_v15, %v1486_v17 }
 0x24d   : > { %1804 = vst [vmem:[%s3093_s15 + $0x1e8] sm:$0xff] %v1740_v18  ;;  %v1741_v21 = vmax.f32 %v1677_v19, 0.0 }
 0x24e   : > { %v1742_v42 = vmax.f32 %v1678_v20, 0.0 }
 0x24f   : > { %1805 = vst [vmem:[%s3093_s15 + $0x1f0] sm:$0xff] %v1741_v21 }
 0x250   : > { %1806 = vst [vmem:[%s3093_s15 + $0x1f8] sm:$0xff] %v1742_v42 }
 0x251 PF: > { %s1808_s0 = scalar_lea.sflag [#allocation5], %s3083_s28  ;;  %s3589_s19 = sld [smem:[#allocation26_spill]] }
 0x257   : > { %p3590_p11 = scmp.ne.s32.totalorder %s3589_s19, 0 }
 0x258   : > { %s3591_s5 = sld [smem:[#allocation18_spill]] (%p3590_p11) }
 0x259   : > { %1814 = sbr.rel (!%p3590_p11) target bundleno = 638 (0x27e), region = 64 }
 0x25e   : > { %s2064_s24 = sshll.u32 %s3591_s5, 6 }
 0x25f   : > { %s1816_s21 = ssub.s32 75, %s2064_s24 }
 0x260   : > { %p1817_p10 = scmp.lt.s32.totalorder %s1816_s21, 64 }
 0x262   : > { %s3627_s21 = smov (!%p1817_p10, %s1816_s21), 64 }
 0x263   : > { %s3439_s11 = sshll.u32 %s3627_s21, 7 }
 0x264   : > { %s1821_s26 = ssub.s32 8192, %s3439_s11 }
 0x265   : > { %1822 = vsyncadd %s1808_s0, %s1821_s26  ;;  %p2066_p0 = scmp.ne.s32.totalorder %s3439_s11, 0  ;;  %s2075_s16 = sshll.u32 %s3591_s5, 13 }
 0x266   : > { %s3592_s12 = sld [smem:[#allocation31_spill]]  ;;  %s1828_s17 = sshll.u32 %s3093_s15, 4  ;;  %s3452_s17 = int_to_ptr.vmem [resolvable:$true] %s1828_s17 }
 0x267   : > { %s2621_s27 = scalar_lea.vmem %s3452_s17, %s3439_s11  ;;  %s2786_s2 = smov [#allocation9]  }
 0x268   : > { %p2622_p3 = scmp.ne.s32.totalorder %s3452_s17, %s2621_s27  ;;  %s2625_s8 = sshll.u32 %s2786_s2, 4  ;;  %s2626_s8 = int_to_ptr.vmem [resolvable:$false] %s2625_s8 }
 0x269   : > { %s2627_s18 = scalar_lea.vmem %s2626_s8, 16384  ;;  %p2628_p2 = scmp.lt.s32.totalorder %s3452_s17, %s2626_s8 }
 0x26a   : > { %p2623_p7 = pnand %p2622_p3, %p2066_p0  ;;  %p2629_p4 = scmp.lt.s32.totalorder %s2627_s18, %s2621_s27 }
 0x26c   : > { %s3449_s7 = scalar_lea.hbm %s3592_s12, %s2075_s16  ;;  %p2624_p9 = pneg %p2623_p7 }
 0x26d   : > { %p2630_p6 = por %p2629_p4, %p2628_p2 }
 0x26f   : > { %p2631_p1 = pnand %p2630_p6, %p2624_p9 }
 0x271   : > { %2634 = shalt.err (!%p2631_p1)
}
 0x272   : > { %s2635_s15 = scalar_lea.hbm %s3449_s7, %s3439_s11  ;;  %s2639_s3 = scalar_lea.hbm %s3592_s12, 9600 }
 0x273   : > { %p2636_p12 = scmp.ne.s32.totalorder %s3449_s7, %s2635_s15  ;;  %p2640_p13 = scmp.lt.s32.totalorder %s3449_s7, %s3592_s12 }
 0x274   : > { %p2641_p11 = scmp.lt.s32.totalorder %s2639_s3, %s2635_s15 }
 0x275   : > { %p2637_p8 = pnand %p2636_p12, %p2066_p0 }
 0x276   : > { %p2642_p10 = por %p2641_p11, %p2640_p13 }
 0x277   : > { %p2638_p5 = pneg %p2637_p8 }
 0x279   : > { %p2643_p3 = pnand %p2642_p10, %p2638_p5 }
 0x27b   : > { %2646 = shalt.err (!%p2643_p3)
}
 0x27c   : > { %s2787_s24 = smov 128   ;;  %s2788_s21 = smov 8  }
 0x27d   : > { %1834 = dma.vmem_to_hbm [thread:$0]  (%p2066_p0), %s3452_s17, %s3439_s11, %s3449_s7, %s1808_s0, %s2787_s24, %s2787_s24, %s2788_s21  }
 0x27e PF: > { %s3593_s26 = sld [smem:[#allocation14_spill]]  ;;  %p2380_p7 = scmp.ge.s32.totalorder %s2773_s6, 2 }
 0x27f   : > { %s3594_s16 = sld [smem:[#allocation27_spill]] }
 0x284   : > { %s1843_s10 = sand.u32 1, %s3593_s26  }
 0x285   : > { %p3595_p9 = scmp.ne.s32.totalorder %s3594_s16, 0  ;;  %s1844_s14 = scalar_lea.sflag [#allocation5], %s1843_s10 }
 0x287   : > { %p2377_p2 = pnand %p2380_p7, %p3595_p9 }
 0x289   : > { %p2378_p4 = pneg %p2377_p2 }
 0x28b   : > { %2716 = dma.done.wait (%p2378_p4), %s1844_s14, 8192  }
 0x28c   : > { %2718 = vsyncadd (%p2378_p4), %s1844_s14, 4294959104  ;;  %s24_s6 = sadd.s32 1, %s2773_s6   ;;  %s3597_s18 = sld [smem:[#allocation15_spill]] }
 0x28d   : > { %p3484_p6 = scmp.ge.s32.totalorder %s24_s6, 6   ;;  %s3598_s28 = sld [smem:[#allocation24_spill]] }
 0x28e   : > { %s3599_s0 = sld [smem:[#allocation21_spill]]  ;;  %s3605_s19 = smov %s2729_s20 }
 0x28f   : > { %s3600_s11 = sld [smem:[#allocation16_spill]]  ;;  %s3607_s21 = smov %s2737_s22 }
 0x290   : > { %s3601_s26 = sld [smem:[#allocation22_spill]]  ;;  %s3608_s22 = smov %s2741_s23 }
 0x291   : > { %s3602_s7 = sld [smem:[#allocation19_spill]]  ;;  %s3610_s24 = smov %s2749_s25 }
 0x292   : > { %s3603_s17 = sld [smem:[#allocation20_spill]]  ;;  %s3612_s27 = smov %s2765_s29 }
 0x293   : > { %s3606_s20 = smov %s3598_s28  ;;  %s3613_s28 = smov %s2769_s30 }
 0x294   : > { %s3609_s23 = smov %s3599_s0  ;;  %23 = sbr.rel (!%p3484_p6) target bundleno = 17 (0x11), region = 123 }
 0x295   : > { %s3611_s25 = smov %s3600_s11 }
 0x297   : > { %s3614_s29 = smov %s3602_s7 }
 0x298   : > { %s3615_s30 = smov %s3603_s17 }
 0x299   :  { %1849 = vsyncpa [#allocation4], 1 }
 0x29a   :  { %1851 = vsyncpa [#allocation4 + $0x1], 1 }
 0x29b   :  { %1852 = vsyncpa [#allocation7], 1 }
 0x29c   :  { %1854 = vsyncpa [#allocation7 + $0x1], 1 }
 0x29d   :  { %1855 = vsyncpa [#allocation5], 1 }
 0x29e   :  { %1857 = vsyncpa [#allocation5 + $0x1], 1 }

</bundles_post_ra>
